<compile_context>
chip_gen: v7x
topology: tpu7x:2x2x1
jax: 0.10.0
libtpu: 0.0.40
codegen_flags: <defaults>
</compile_context>

<pallas_src>
import jax
import jax.numpy as jnp
import numpy as np
from jax.experimental import pallas as pl
from jax.experimental.pallas import tpu as pltpu


def _fused_kernel(x_ref, w_ref, gb_ref, o_ref):
    # x_ref:  (Cin, M)    f32   channel-major flattened input (M = N*H*W)
    # w_ref:  (Cb, Cin)   bf16  1x1-conv weight block (Cb = Cout / n_blocks)
    # gb_ref: (Cb, 2)     f32   packed [gamma, beta]
    # o_ref:  (Cb, M)     f32 (or bf16)
    # relu112 in f32, then cast to bf16 right before the MXU dot (monotone, so
    # order relative to the relu is irrelevant).
    x = jnp.maximum(x_ref[...], 0.0).astype(jnp.bfloat16)            # (Cin, M)
    # conv2d112: 1x1 conv == channel matmul, f32 accumulation on the MXU.
    y = jnp.dot(w_ref[...], x, preferred_element_type=jnp.float32)   # (Cb, M) f32

    # batchnorm2d113 (training-mode batch stats), one-pass mean / biased var.
    m = jnp.float32(y.shape[1])
    s1 = jnp.sum(y, axis=1, keepdims=True)                           # (Cb, 1)
    s2 = jnp.sum(y * y, axis=1, keepdims=True)                       # (Cb, 1)
    mean = s1 / m
    var = jnp.maximum(s2 / m - mean * mean, 0.0)

    gb = gb_ref[...]
    gamma = gb[:, 0:1]                                               # (Cb, 1)
    beta = gb[:, 1:2]                                                # (Cb, 1)
    scale = gamma * jax.lax.rsqrt(var + 1e-5)
    shift = beta - mean * scale

    # relu113 fused with the BN affine.
    o_ref[...] = jnp.maximum(y * scale + shift, 0.0).astype(o_ref.dtype)


def prepare_params(w_oihw, gamma, beta):
    """Call ONCE at parameter-load time (outside the per-step hot path).

    Returns (w_bf16 (Cout, Cin), gamma_beta (Cout, 2) f32)."""
    Cout = w_oihw.shape[0]
    w_bf16 = jnp.asarray(w_oihw, jnp.float32).reshape(Cout, -1).astype(jnp.bfloat16)
    gamma_beta = jnp.stack(
        [jnp.asarray(gamma, jnp.float32), jnp.asarray(beta, jnp.float32)], axis=1
    )  # (Cout, 2)
    return w_bf16, gamma_beta


def _num_tensorcores():
    """2 TensorCores per chip on v7x / v4 / v5p, 1 on v5e / v6e."""
    try:
        kind = jax.devices()[0].device_kind.lower()
    except Exception:
        return 1
    if "v7" in kind or "v4" in kind or "v5p" in kind:
        return 2
    return 1


def fused_relu_conv_bn_relu(x_nchw, w_bf16, gamma_beta, *, out_dtype=jnp.float32):
    """x_nchw: (N, Cin, H, W) f32; w_bf16: (Cout, Cin) bf16; gamma_beta: (Cout, 2) f32.

    Returns (N, Cout, H, W) in out_dtype (f32 by default, matching the module)."""
    N, Cin, H, W = x_nchw.shape
    Cout = w_bf16.shape[0]
    M = N * H * W

    # Channel-major flatten.  For N == 1 (the module's shape) this is a free
    # reshape — no transpose kernel is launched.
    if N == 1:
        x_cm = x_nchw.reshape(Cin, M)
    else:
        x_cm = jnp.transpose(x_nchw, (1, 0, 2, 3)).reshape(Cin, M)
    x_cm = x_cm.astype(jnp.float32)   # no wrapper bf16 convert; cast is in-kernel

    # Split Cout across TensorCores when the chip has 2 of them; otherwise a
    # single grid step (extra steps cost ~0.35 us each on 1-TC chips).
    nblk = _num_tensorcores()
    if Cout % nblk != 0 or (Cout // nblk) % 8 != 0:
        nblk = 1
    cb = Cout // nblk

    out_itemsize = np.dtype(out_dtype).itemsize
    cost = pl.CostEstimate(
        flops=2 * M * Cin * Cout,
        transcendentals=Cout,  # one rsqrt per output channel
        bytes_accessed=(x_cm.size * 4 + w_bf16.size * 2 + gamma_beta.size * 4
                        + M * Cout * out_itemsize),
    )

    out_cm = pl.pallas_call(
        _fused_kernel,
        out_shape=jax.ShapeDtypeStruct((Cout, M), out_dtype),
        grid=(nblk,),
        in_specs=[
            # x stays resident across Cout blocks (constant block index -> no re-fetch).
            pl.BlockSpec((Cin, M), lambda i: (0, 0)),
            pl.BlockSpec((cb, Cin), lambda i: (i, 0)),
            pl.BlockSpec((cb, 2), lambda i: (i, 0)),
        ],
        out_specs=pl.BlockSpec((cb, M), lambda i: (i, 0)),
        compiler_params=pltpu.CompilerParams(dimension_semantics=("parallel",)),
        cost_estimate=cost,
    )(x_cm, w_bf16, gamma_beta)

    # (Cout, M) -> NCHW.  Free reshape for N == 1.
    if N == 1:
        return out_cm.reshape(1, Cout, H, W)
    return jnp.transpose(out_cm.reshape(Cout, N, H, W), (1, 0, 2, 3))


if __name__ == "__main__":
    key = jax.random.PRNGKey(0)
    k_x, k_w = jax.random.split(key)

    N, Cin, H, W, Cout = 1, 1056, 7, 7, 192

    # Deterministic synthetic inputs / parameters (no checkpoint load).
    x = jax.random.normal(k_x, (N, Cin, H, W), dtype=jnp.float32)
    bound = 1.0 / (Cin ** 0.5)  # kaiming-uniform-like scale for the 1x1 conv
    w = jax.random.uniform(k_w, (Cout, Cin, 1, 1), dtype=jnp.float32,
                           minval=-bound, maxval=bound)
    gamma = jnp.ones((Cout,), dtype=jnp.float32)   # BatchNorm weight init
    beta = jnp.zeros((Cout,), dtype=jnp.float32)   # BatchNorm bias init

    # Parameter prep happens once, outside the hot path (no per-call converts).
    w_bf16, gamma_beta = prepare_params(w, gamma, beta)
    jax.block_until_ready((w_bf16, gamma_beta))

    # TODO(synk): BatchNorm running_mean/running_var updates (training-side
    # state) are not emitted; only the normalized forward activation is.
    out = fused_relu_conv_bn_relu(x, w_bf16, gamma_beta)
    jax.block_until_ready(out)

    assert out.shape == (N, Cout, H, W), out.shape
    assert bool(jnp.isfinite(out).all())
    print("KERNEL_OK")
</pallas_src>

<mosaic_0001>
module attributes {stable_mosaic.version = 11 : i64} {
  func.func @_fused_kernel(%arg0: i32, %arg1: memref<1056x49xf32, #tpu.memory_space<vmem>>, %arg2: memref<192x1056xbf16, #tpu.memory_space<vmem>>, %arg3: memref<192x2xf32, #tpu.memory_space<vmem>>, %arg4: memref<192x49xf32, #tpu.memory_space<vmem>>) attributes {dimension_semantics = [#tpu.dimension_semantics<parallel>], iteration_bounds = array<i64: 1>, scalar_prefetch = 0 : i64, scratch_operands = 0 : i64, tpu.core_type = #tpu.core_type<tc>, window_params = [{pipeline_mode = #tpu.pipeline_mode<synchronous>, transform_indices = @transform_0, window_bounds = array<i64: 1056, 49>}, {transform_indices = @transform_1, window_bounds = array<i64: 192, 1056>}, {transform_indices = @transform_2, window_bounds = array<i64: 192, 2>}, {transform_indices = @transform_3, window_bounds = array<i64: 192, 49>}]} {
    %c0 = arith.constant 0 : index
    %c0_0 = arith.constant 0 : index
    %0 = vector.load %arg1[%c0, %c0_0] : memref<1056x49xf32, #tpu.memory_space<vmem>>, vector<1056x49xf32>
    %cst = arith.constant 0.000000e+00 : f32
    %1 = vector.broadcast %cst : f32 to vector<1056x49xf32>
    %2 = arith.maximumf %0, %1 : vector<1056x49xf32>
    %3 = arith.truncf %2 : vector<1056x49xf32> to vector<1056x49xbf16>
    %c0_1 = arith.constant 0 : index
    %c0_2 = arith.constant 0 : index
    %4 = vector.load %arg2[%c0_1, %c0_2] : memref<192x1056xbf16, #tpu.memory_space<vmem>>, vector<192x1056xbf16>
    %cst_3 = arith.constant dense<0.000000e+00> : vector<192x49xf32>
    %5 = tpu.matmul %4, %3, %cst_3 {dimension_numbers = #tpu.dot_dimension_numbers<[1], [0], [0], [1], [0, 0, 1, 1], [], []>} : vector<192x1056xbf16>, vector<1056x49xbf16>, vector<192x49xf32> -> vector<192x49xf32>
    %cst_4 = arith.constant dense<0.000000e+00> : vector<192xf32>
    %6 = vector.multi_reduction <add>, %5, %cst_4 [1] : vector<192x49xf32> to vector<192xf32>
    %7 = vector.shape_cast %6 : vector<192xf32> to vector<192x1xf32>
    %8 = arith.mulf %5, %5 : vector<192x49xf32>
    %cst_5 = arith.constant dense<0.000000e+00> : vector<192xf32>
    %9 = vector.multi_reduction <add>, %8, %cst_5 [1] : vector<192x49xf32> to vector<192xf32>
    %10 = vector.shape_cast %9 : vector<192xf32> to vector<192x1xf32>
    %cst_6 = arith.constant 4.900000e+01 : f32
    %11 = vector.broadcast %cst_6 : f32 to vector<192x1xf32>
    %12 = arith.divf %7, %11 : vector<192x1xf32>
    %cst_7 = arith.constant 4.900000e+01 : f32
    %13 = vector.broadcast %cst_7 : f32 to vector<192x1xf32>
    %14 = arith.divf %10, %13 : vector<192x1xf32>
    %15 = arith.mulf %12, %12 : vector<192x1xf32>
    %16 = arith.subf %14, %15 : vector<192x1xf32>
    %cst_8 = arith.constant 0.000000e+00 : f32
    %17 = vector.broadcast %cst_8 : f32 to vector<192x1xf32>
    %18 = arith.maximumf %16, %17 : vector<192x1xf32>
    %c0_9 = arith.constant 0 : index
    %c0_10 = arith.constant 0 : index
    %19 = vector.load %arg3[%c0_9, %c0_10] : memref<192x2xf32, #tpu.memory_space<vmem>>, vector<192x2xf32>
    %20 = vector.extract_strided_slice %19 {offsets = [0, 0], sizes = [192, 1], strides = [1, 1]} : vector<192x2xf32> to vector<192x1xf32>
    %21 = vector.extract_strided_slice %19 {offsets = [0, 1], sizes = [192, 1], strides = [1, 1]} : vector<192x2xf32> to vector<192x1xf32>
    %cst_11 = arith.constant 9.99999974E-6 : f32
    %22 = vector.broadcast %cst_11 : f32 to vector<192x1xf32>
    %23 = arith.addf %18, %22 : vector<192x1xf32>
    %24 = math.rsqrt %23 : vector<192x1xf32>
    %25 = arith.mulf %20, %24 : vector<192x1xf32>
    %26 = arith.mulf %12, %25 : vector<192x1xf32>
    %27 = arith.subf %21, %26 : vector<192x1xf32>
    %28 = vector.broadcast %25 : vector<192x1xf32> to vector<192x49xf32>
    %29 = arith.mulf %5, %28 : vector<192x49xf32>
    %30 = vector.broadcast %27 : vector<192x1xf32> to vector<192x49xf32>
    %31 = arith.addf %29, %30 : vector<192x49xf32>
    %cst_12 = arith.constant 0.000000e+00 : f32
    %32 = vector.broadcast %cst_12 : f32 to vector<192x49xf32>
    %33 = arith.maximumf %31, %32 : vector<192x49xf32>
    %c0_13 = arith.constant 0 : index
    %c0_14 = arith.constant 0 : index
    %34 = vector.load %arg4[%c0_13, %c0_14] : memref<192x49xf32, #tpu.memory_space<vmem>>, vector<192x49xf32>
    tpu.vector_store %arg4[%c0_13, %c0_14], %33 {strides = array<i32>} : memref<192x49xf32, #tpu.memory_space<vmem>>, vector<192x49xf32>,
    return
  }
  func.func @transform_0(%arg0: i32) -> (i32, i32) {
    %c0_i32 = arith.constant 0 : i32
    %c0_i32_0 = arith.constant 0 : i32
    %c0_i32_1 = arith.constant 0 : i32
    return %c0_i32, %c0_i32_0 : i32, i32
  }
  func.func @transform_1(%arg0: i32) -> (i32, i32) {
    %c0_i32 = arith.constant 0 : i32
    %c0_i32_0 = arith.constant 0 : i32
    return %arg0, %c0_i32 : i32, i32
  }
  func.func @transform_2(%arg0: i32) -> (i32, i32) {
    %c0_i32 = arith.constant 0 : i32
    %c0_i32_0 = arith.constant 0 : i32
    return %arg0, %c0_i32 : i32, i32
  }
  func.func @transform_3(%arg0: i32) -> (i32, i32) {
    %c0_i32 = arith.constant 0 : i32
    %c0_i32_0 = arith.constant 0 : i32
    return %arg0, %c0_i32 : i32, i32
  }
}

</mosaic_0001>

<bundles_post_ra>
// kernel: tpu_custom_call.1
= control target key start
LH: loop header
LB: loop body
LE: loop exit
PB: predicated region body
PF: predicated region fallthrough
CT: control target
= control target key end

     0   :  { %vm1005_vm0 = vcmask 261120   ;;  %vm1687_vm1 = vcmask 400384   ;;  %s3287_s10 = smov 1   ;;  %s4870_s0 = inlined_call_operand.vmem [shape: f32[1056,49], index: 0, kind: input, shape index: {}]   ;;  %s4871_s1 = inlined_call_operand.vmem [shape: bf16[192,1056], index: 1, kind: input, shape index: {}]   ;;  %s4872_s2 = inlined_call_operand.vmem [shape: f32[192,2], index: 2, kind: input, shape index: {}]   ;;  %s4873_s3 = inlined_call_operand.vmem [shape: f32[192,49], index: 3, kind: output, shape index: {}]  }
   0x1   :  { %v31_v0 = vld [vmem:[%s4870_s0 + $0x80] sm:$0xff]  ;;  %v32_v1 = vld [vmem:[%s4870_s0 + $0x88] sm:$0xff]  ;;  %v33_v14 = vld [vmem:[%s4870_s0 + $0x90] sm:$0xff] }
   0x2   :  { %v63_v2 = vld [vmem:[%s4870_s0 + $0x180] sm:$0xff]  ;;  %v163_v3 = vmax.f32 %v31_v0, 0.0  ;;  %v164_v4 = vmax.f32 %v32_v1, 0.0  ;;  %v64_v5 = vld [vmem:[%s4870_s0 + $0x188] sm:$0xff]  ;;  %v34_v18 = vld [vmem:[%s4870_s0 + $0x98] sm:$0xff]  ;;  %v165_v19 = vmax.f32 %v33_v14, 0.0 }
   0x3   :  { %v195_v6 = vmax.f32 %v63_v2, 0.0  ;;  %v15_v7 = vld [vmem:[%s4870_s0] sm:$0xff]  ;;  %v16_v8 = vld [vmem:[%s4870_s0 + $0x8] sm:$0xff]  ;;  %v196_v9 = vmax.f32 %v64_v5, 0.0  ;;  %v65_v20 = vld [vmem:[%s4870_s0 + $0x190] sm:$0xff]  ;;  %v166_v24 = vmax.f32 %v34_v18, 0.0 }
   0x4   :  { %v147_v10 = vmax.f32 %v15_v7, 0.0  ;;  %v148_v11 = vmax.f32 %v16_v8, 0.0  ;;  %v47_v12 = vld [vmem:[%s4870_s0 + $0x100] sm:$0xff]  ;;  %v48_v13 = vld [vmem:[%s4870_s0 + $0x108] sm:$0xff]  ;;  %v287_v15 = vpack.c.bf16 %v164_v4, %v163_v3  ;;  %v66_v21 = vld [vmem:[%s4870_s0 + $0x198] sm:$0xff]  ;;  %v197_v25 = vmax.f32 %v65_v20, 0.0 }
   0x5   :  { %v179_v16 = vmax.f32 %v47_v12, 0.0  ;;  %v180_v17 = vmax.f32 %v48_v13, 0.0  ;;  %v303_v22 = vpack.c.bf16 %v196_v9, %v195_v6  ;;  %v17_v26 = vld [vmem:[%s4870_s0 + $0x10] sm:$0xff]  ;;  %v18_v27 = vld [vmem:[%s4870_s0 + $0x18] sm:$0xff]  ;;  %v198_v30 = vmax.f32 %v66_v21, 0.0  ;;  %v35_v34 = vld [vmem:[%s4870_s0 + $0xa0] sm:$0xff] }
   0x6   :  { %v279_v23 = vpack.c.bf16 %v148_v11, %v147_v10  ;;  %v49_v28 = vld [vmem:[%s4870_s0 + $0x110] sm:$0xff]  ;;  %2677 = vmatprep.subr.bf16.mxu0 %v287_v15  ;;  %v149_v31 = vmax.f32 %v17_v26, 0.0  ;;  %v150_v32 = vmax.f32 %v18_v27, 0.0  ;;  %v50_v33 = vld [vmem:[%s4870_s0 + $0x118] sm:$0xff]  ;;  %v36_v35 = vld [vmem:[%s4870_s0 + $0xa8] sm:$0xff]  ;;  %v288_v36 = vpack.c.bf16 %v166_v24, %v165_v19 }
   0x7   :  { %v295_v29 = vpack.c.bf16 %v180_v17, %v179_v16  ;;  %2765 = vmatprep.subr.bf16.mxu1 %v303_v22  ;;  %v181_v37 = vmax.f32 %v49_v28, 0.0  ;;  %v182_v38 = vmax.f32 %v50_v33, 0.0  ;;  %v167_v39 = vmax.f32 %v35_v34, 0.0  ;;  %v67_v40 = vld [vmem:[%s4870_s0 + $0x1a0] sm:$0xff]  ;;  %v68_v41 = vld [vmem:[%s4870_s0 + $0x1a8] sm:$0xff]  ;;  %v37_v54 = vld [vmem:[%s4870_s0 + $0xb0] sm:$0xff] }
   0x8   :  { %2678 = vmatpush3.bf16.msra.mxu0 %v279_v23  ;;  %v19_v42 = vld [vmem:[%s4870_s0 + $0x20] sm:$0xff]  ;;  %v304_v43 = vpack.c.bf16 %v198_v30, %v197_v25  ;;  %v280_v44 = vpack.c.bf16 %v150_v32, %v149_v31  ;;  %v168_v45 = vmax.f32 %v36_v35, 0.0  ;;  %v199_v46 = vmax.f32 %v67_v40, 0.0  ;;  %v20_v47 = vld [vmem:[%s4870_s0 + $0x28] sm:$0xff]  ;;  %v38_v55 = vld [vmem:[%s4870_s0 + $0xb8] sm:$0xff] }
   0x9   :  { %2766 = vmatpush3.bf16.msra.mxu1 %v295_v29  ;;  %v51_v48 = vld [vmem:[%s4870_s0 + $0x120] sm:$0xff]  ;;  %v52_v49 = vld [vmem:[%s4870_s0 + $0x128] sm:$0xff]  ;;  %2679 = vmatprep.subr.bf16.mxu0 %v288_v36  ;;  %v296_v50 = vpack.c.bf16 %v182_v38, %v181_v37  ;;  %v200_v51 = vmax.f32 %v68_v41, 0.0  ;;  %v151_v52 = vmax.f32 %v19_v42, 0.0  ;;  %v152_v53 = vmax.f32 %v20_v47, 0.0  ;;  %v69_v56 = vld [vmem:[%s4870_s0 + $0x1b0] sm:$0xff] }
   0xa   :  { %2767 = vmatprep.subr.bf16.mxu1 %v304_v43  ;;  %v289_v57 = vpack.c.bf16 %v168_v45, %v167_v39  ;;  %v183_v58 = vmax.f32 %v51_v48, 0.0  ;;  %v184_v59 = vmax.f32 %v52_v49, 0.0  ;;  %v169_v60 = vmax.f32 %v37_v54, 0.0  ;;  %v70_v61 = vld [vmem:[%s4870_s0 + $0x1b8] sm:$0xff]  ;;  %v21_v62 = vld [vmem:[%s4870_s0 + $0x30] sm:$0xff]  ;;  %v39_v6 = vld [vmem:[%s4870_s0 + $0xc0] sm:$0xff] }
   0xb   :  { %v22_v63 = vld [vmem:[%s4870_s0 + $0x38] sm:$0xff]  ;;  %v305_v0 = vpack.c.bf16 %v200_v51, %v199_v46  ;;  %v281_v1 = vpack.c.bf16 %v152_v53, %v151_v52  ;;  %v170_v2 = vmax.f32 %v38_v55, 0.0  ;;  %v201_v3 = vmax.f32 %v69_v56, 0.0  ;;  %v53_v4 = vld [vmem:[%s4870_s0 + $0x130] sm:$0xff]  ;;  %v40_v11 = vld [vmem:[%s4870_s0 + $0xc8] sm:$0xff] }
   0xc   :  { %2680 = vmatpush3.bf16.msra.mxu0 %v280_v44  ;;  %v54_v5 = vld [vmem:[%s4870_s0 + $0x138] sm:$0xff]  ;;  %v297_v7 = vpack.c.bf16 %v184_v59, %v183_v58  ;;  %v202_v8 = vmax.f32 %v70_v61, 0.0  ;;  %v153_v9 = vmax.f32 %v21_v62, 0.0  ;;  %v154_v10 = vmax.f32 %v22_v63, 0.0  ;;  %v71_v12 = vld [vmem:[%s4870_s0 + $0x1c0] sm:$0xff]  ;;  %v72_v13 = vld [vmem:[%s4870_s0 + $0x1c8] sm:$0xff] }
   0xd   :  { %2768 = vmatpush3.bf16.msra.mxu1 %v296_v50  ;;  %2681 = vmatprep.subr.bf16.mxu0 %v289_v57  ;;  %v290_v14 = vpack.c.bf16 %v170_v2, %v169_v60  ;;  %v185_v15 = vmax.f32 %v53_v4, 0.0  ;;  %v186_v16 = vmax.f32 %v54_v5, 0.0  ;;  %v171_v17 = vmax.f32 %v39_v6, 0.0  ;;  %v23_v18 = vld [vmem:[%s4870_s0 + $0x40] sm:$0xff]  ;;  %v24_v19 = vld [vmem:[%s4870_s0 + $0x48] sm:$0xff]  ;;  %v41_v26 = vld [vmem:[%s4870_s0 + $0xd0] sm:$0xff] }
   0xe   :  { %2769 = vmatprep.subr.bf16.mxu1 %v305_v0  ;;  %v55_v20 = vld [vmem:[%s4870_s0 + $0x140] sm:$0xff]  ;;  %v306_v21 = vpack.c.bf16 %v202_v8, %v201_v3  ;;  %v282_v22 = vpack.c.bf16 %v154_v10, %v153_v9  ;;  %v172_v23 = vmax.f32 %v40_v11, 0.0  ;;  %v203_v24 = vmax.f32 %v71_v12, 0.0  ;;  %v56_v25 = vld [vmem:[%s4870_s0 + $0x148] sm:$0xff]  ;;  %v42_v27 = vld [vmem:[%s4870_s0 + $0xd8] sm:$0xff] }
   0xf   :  { %v298_v28 = vpack.c.bf16 %v186_v16, %v185_v15  ;;  %v204_v29 = vmax.f32 %v72_v13, 0.0  ;;  %v155_v30 = vmax.f32 %v23_v18, 0.0  ;;  %v156_v31 = vmax.f32 %v24_v19, 0.0  ;;  %v73_v32 = vld [vmem:[%s4870_s0 + $0x1d0] sm:$0xff]  ;;  %v74_v33 = vld [vmem:[%s4870_s0 + $0x1d8] sm:$0xff]  ;;  %v43_v45 = vld [vmem:[%s4870_s0 + $0xe0] sm:$0xff] }
  0x10   :  { %2682 = vmatpush3.bf16.msra.mxu0 %v281_v1  ;;  %v291_v34 = vpack.c.bf16 %v172_v23, %v171_v17  ;;  %v187_v35 = vmax.f32 %v55_v20, 0.0  ;;  %v188_v36 = vmax.f32 %v56_v25, 0.0  ;;  %v173_v37 = vmax.f32 %v41_v26, 0.0  ;;  %v25_v38 = vld [vmem:[%s4870_s0 + $0x50] sm:$0xff]  ;;  %v26_v39 = vld [vmem:[%s4870_s0 + $0x58] sm:$0xff]  ;;  %v44_v46 = vld [vmem:[%s4870_s0 + $0xe8] sm:$0xff] }
  0x11   :  { %2770 = vmatpush3.bf16.msra.mxu1 %v297_v7  ;;  %2683 = vmatprep.subr.bf16.mxu0 %v290_v14  ;;  %v57_v40 = vld [vmem:[%s4870_s0 + $0x150] sm:$0xff]  ;;  %v307_v41 = vpack.c.bf16 %v204_v29, %v203_v24  ;;  %v174_v42 = vmax.f32 %v42_v27, 0.0  ;;  %v205_v43 = vmax.f32 %v73_v32, 0.0  ;;  %v58_v44 = vld [vmem:[%s4870_s0 + $0x158] sm:$0xff]  ;;  %v283_v47 = vpack.c.bf16 %v156_v31, %v155_v30  ;;  %v75_v49 = vld [vmem:[%s4870_s0 + $0x1e0] sm:$0xff] }
  0x12   :  { %2771 = vmatprep.subr.bf16.mxu1 %v306_v21  ;;  %v206_v48 = vmax.f32 %v74_v33, 0.0  ;;  %v76_v50 = vld [vmem:[%s4870_s0 + $0x1e8] sm:$0xff]  ;;  %v299_v51 = vpack.c.bf16 %v188_v36, %v187_v35  ;;  %v157_v53 = vmax.f32 %v25_v38, 0.0  ;;  %v158_v54 = vmax.f32 %v26_v39, 0.0  ;;  %v27_v55 = vld [vmem:[%s4870_s0 + $0x60] sm:$0xff]  ;;  %v45_v2 = vld [vmem:[%s4870_s0 + $0xf0] sm:$0xff] }
  0x13   :  { %v292_v52 = vpack.c.bf16 %v174_v42, %v173_v37  ;;  %v28_v56 = vld [vmem:[%s4870_s0 + $0x68] sm:$0xff]  ;;  %v189_v57 = vmax.f32 %v57_v40, 0.0  ;;  %v190_v58 = vmax.f32 %v58_v44, 0.0  ;;  %v175_v59 = vmax.f32 %v43_v45, 0.0  ;;  %v59_v61 = vld [vmem:[%s4870_s0 + $0x160] sm:$0xff]  ;;  %v46_v3 = vld [vmem:[%s4870_s0 + $0xf8] sm:$0xff] }
  0x14   :  { %2684 = vmatpush3.bf16.msra.mxu0 %v282_v22  ;;  %v176_v60 = vmax.f32 %v44_v46, 0.0  ;;  %v60_v62 = vld [vmem:[%s4870_s0 + $0x168] sm:$0xff]  ;;  %v308_v63 = vpack.c.bf16 %v206_v48, %v205_v43  ;;  %v207_v0 = vmax.f32 %v75_v49, 0.0  ;;  %v208_v1 = vmax.f32 %v76_v50, 0.0  ;;  %v77_v4 = vld [vmem:[%s4870_s0 + $0x1f0] sm:$0xff]  ;;  %v78_v7 = vld [vmem:[%s4870_s0 + $0x1f8] sm:$0xff] }
  0x15   :  { %2772 = vmatpush3.bf16.msra.mxu1 %v298_v28  ;;  %2685 = vmatprep.subr.bf16.mxu0 %v291_v34  ;;  %v159_v5 = vmax.f32 %v27_v55, 0.0  ;;  %v160_v6 = vmax.f32 %v28_v56, 0.0  ;;  %v284_v8 = vpack.c.bf16 %v158_v54, %v157_v53  ;;  %v191_v9 = vmax.f32 %v59_v61, 0.0  ;;  %v29_v11 = vld [vmem:[%s4870_s0 + $0x70] sm:$0xff]  ;;  %v30_v12 = vld [vmem:[%s4870_s0 + $0x78] sm:$0xff]  ;;  %v127_v25 = vld [vmem:[%s4870_s0 + $0x380] sm:$0xff] }
  0x16   :  { %2773 = vmatprep.subr.bf16.mxu1 %v307_v41  ;;  %v192_v10 = vmax.f32 %v60_v62, 0.0  ;;  %v3084_v13 = vld [vmem:[%s4871_s1 + $0x4] ss:$36 sps:$4 sm:$0xff]   ;;  %v300_v14 = vpack.c.bf16 %v190_v58, %v189_v57  ;;  %v293_v15 = vpack.c.bf16 %v176_v60, %v175_v59  ;;  %v177_v16 = vmax.f32 %v45_v2, 0.0  ;;  %v61_v18 = vld [vmem:[%s4870_s0 + $0x170] sm:$0xff]  ;;  %v62_v22 = vld [vmem:[%s4870_s0 + $0x178] sm:$0xff] }
  0x17   :  { %v178_v17 = vmax.f32 %v46_v3, 0.0  ;;  %v309_v19 = vpack.c.bf16 %v208_v1, %v207_v0  ;;  %v209_v20 = vmax.f32 %v77_v4, 0.0  ;;  %v210_v21 = vmax.f32 %v78_v7, 0.0  ;;  %1074 = vmatprep.mubr.bf16.mxu0 %v3084_v13  ;;  %v3087_v23 = vld [vmem:[%s4871_s1 + $0xc] ss:$36 sps:$4 sm:$0xff]   ;;  %v111_v31 = vld [vmem:[%s4870_s0 + $0x300] sm:$0xff] }
  0x18   :  { %2686 = vmatpush3.bf16.msra.mxu0 %v283_v47  ;;  %v285_v24 = vpack.c.bf16 %v160_v6, %v159_v5  ;;  %v128_v26 = vld [vmem:[%s4870_s0 + $0x388] sm:$0xff]  ;;  %v301_v27 = vpack.c.bf16 %v192_v10, %v191_v9  ;;  %v161_v28 = vmax.f32 %v29_v11, 0.0  ;;  %v162_v29 = vmax.f32 %v30_v12, 0.0  ;;  %1203 = vmatprep.mubr.bf16.mxu1 %v3087_v23  ;;  %v95_v32 = vld [vmem:[%s4870_s0 + $0x280] sm:$0xff]  ;;  %v129_v47 = vld [vmem:[%s4870_s0 + $0x390] sm:$0xff] }
  0x19   :  { %2774 = vmatpush3.bf16.msra.mxu1 %v299_v51  ;;  %2687 = vmatprep.subr.bf16.mxu0 %v292_v52  ;;  %v193_v30 = vmax.f32 %v61_v18, 0.0  ;;  %v96_v33 = vld [vmem:[%s4870_s0 + $0x288] sm:$0xff]  ;;  %v79_v34 = vld [vmem:[%s4870_s0 + $0x200] sm:$0xff]  ;;  %v294_v35 = vpack.c.bf16 %v178_v17, %v177_v16  ;;  %v194_v36 = vmax.f32 %v62_v22, 0.0  ;;  %v227_v37 = vmax.f32 %v95_v32, 0.0  ;;  %v130_v48 = vld [vmem:[%s4870_s0 + $0x398] sm:$0xff] }
  0x1a   :  { %2775 = vmatprep.subr.bf16.mxu1 %v308_v63  ;;  %v228_v38 = vmax.f32 %v96_v33, 0.0  ;;  %v80_v39 = vld [vmem:[%s4870_s0 + $0x208] sm:$0xff]  ;;  %v310_v40 = vpack.c.bf16 %v210_v21, %v209_v20  ;;  %v259_v41 = vmax.f32 %v127_v25, 0.0  ;;  %v260_v42 = vmax.f32 %v128_v26, 0.0  ;;  %v113_v53 = vld [vmem:[%s4870_s0 + $0x310] sm:$0xff]  ;;  %v114_v57 = vld [vmem:[%s4870_s0 + $0x318] sm:$0xff] }
  0x1b   :  { %v112_v43 = vld [vmem:[%s4870_s0 + $0x308] sm:$0xff]  ;;  %v286_v44 = vpack.c.bf16 %v162_v29, %v161_v28  ;;  %v211_v45 = vmax.f32 %v79_v34, 0.0  ;;  %v212_v46 = vmax.f32 %v80_v39, 0.0  ;;  %v302_v49 = vpack.c.bf16 %v194_v36, %v193_v30  ;;  %v3082_v58 = vld [vmem:[%s4871_s1] ss:$36 sps:$4 sm:$0xff]   ;;  %v97_v59 = vld [vmem:[%s4870_s0 + $0x290] sm:$0xff] }
  0x1c   :  { %2688 = vmatpush3.bf16.msra.mxu0 %v284_v8  ;;  %v243_v50 = vmax.f32 %v111_v31, 0.0  ;;  %v244_v51 = vmax.f32 %v112_v43, 0.0  ;;  %v319_v52 = vpack.c.bf16 %v228_v38, %v227_v37  ;;  %v335_v54 = vpack.c.bf16 %v260_v42, %v259_v41  ;;  %v98_v60 = vld [vmem:[%s4870_s0 + $0x298] sm:$0xff]  ;;  %v3085_v61 = vld [vmem:[%s4871_s1 + $0x8] ss:$36 sps:$4 sm:$0xff]   ;;  %v81_v5 = vld [vmem:[%s4870_s0 + $0x210] sm:$0xff] }
  0x1d   :  { %2776 = vmatpush3.bf16.msra.mxu1 %v300_v14  ;;  %2689 = vmatprep.subr.bf16.mxu0 %v293_v15  ;;  %v261_v55 = vmax.f32 %v129_v47, 0.0  ;;  %v262_v56 = vmax.f32 %v130_v48, 0.0  ;;  %v311_v62 = vpack.c.bf16 %v212_v46, %v211_v45  ;;  %v3088_v63 = vld [vmem:[%s4871_s1 + $0x4c] ss:$36 sps:$4 sm:$0xff]   ;;  %v229_v0 = vmax.f32 %v97_v59, 0.0  ;;  %v82_v6 = vld [vmem:[%s4870_s0 + $0x218] sm:$0xff] }
  0x1e   :  { %2777 = vmatprep.subr.bf16.mxu1 %v309_v19  ;;  %v230_v1 = vmax.f32 %v98_v60, 0.0  ;;  %v327_v2 = vpack.c.bf16 %v244_v51, %v243_v50  ;;  %v245_v3 = vmax.f32 %v113_v53, 0.0  ;;  %v246_v4 = vmax.f32 %v114_v57, 0.0  ;;  %v3090_v7 = vld [vmem:[%s4871_s1 + $0x54] ss:$36 sps:$4 sm:$0xff]   ;;  %v131_v13 = vld [vmem:[%s4870_s0 + $0x3a0] sm:$0xff] }
  0x1f   :  { %v336_v8 = vpack.c.bf16 %v262_v56, %v261_v55  ;;  %v213_v9 = vmax.f32 %v81_v5, 0.0  ;;  %v214_v10 = vmax.f32 %v82_v6, 0.0  ;;  %v132_v14 = vld [vmem:[%s4870_s0 + $0x3a8] sm:$0xff]  ;;  %v263_v17 = vmax.f32 %v131_v13, 0.0  ;;  %v115_v19 = vld [vmem:[%s4870_s0 + $0x320] sm:$0xff]  ;;  %v133_v37 = vld [vmem:[%s4870_s0 + $0x3b0] sm:$0xff] }
  0x20   :  { %2690 = vmatpush3.bf16.msra.mxu0 %v285_v24  ;;  %v320_v11 = vpack.c.bf16 %v230_v1, %v229_v0  ;;  %v3092_v15 = vld [vmem:[%s4871_s1 + $0x48] ss:$36 sps:$4 sm:$0xff]   ;;  %v328_v16 = vpack.c.bf16 %v246_v4, %v245_v3  ;;  %v264_v18 = vmax.f32 %v132_v14, 0.0  ;;  %v99_v21 = vld [vmem:[%s4870_s0 + $0x2a0] sm:$0xff]  ;;  %v247_v22 = vmax.f32 %v115_v19, 0.0  ;;  %v134_v39 = vld [vmem:[%s4870_s0 + $0x3b8] sm:$0xff] }
  0x21   :  { %2778 = vmatpush3.bf16.msra.mxu1 %v301_v27  ;;  %2691 = vmatprep.subr.bf16.mxu0 %v294_v35  ;;  %v312_v12 = vpack.c.bf16 %v214_v10, %v213_v9  ;;  %v116_v20 = vld [vmem:[%s4870_s0 + $0x328] sm:$0xff]  ;;  %v231_v25 = vmax.f32 %v99_v21, 0.0  ;;  %v83_v26 = vld [vmem:[%s4870_s0 + $0x220] sm:$0xff]  ;;  %v3093_v32 = vld [vmem:[%s4871_s1 + $0x50] ss:$36 sps:$4 sm:$0xff]   ;;  %v266_v43 = vmax.f32 %v134_v39, 0.0 }
  0x22   :  { %2779 = vmatprep.subr.bf16.mxu1 %v310_v40  ;;  %v248_v23 = vmax.f32 %v116_v20, 0.0  ;;  %v100_v24 = vld [vmem:[%s4870_s0 + $0x2a8] sm:$0xff]  ;;  %v337_v28 = vpack.c.bf16 %v264_v18, %v263_v17  ;;  %v215_v30 = vmax.f32 %v83_v26, 0.0  ;;  %v3094_v33 = vld [vmem:[%s4871_s1 + $0x94] ss:$36 sps:$4 sm:$0xff]   ;;  %v265_v40 = vmax.f32 %v133_v37, 0.0 }
  0x23   :  { %v84_v27 = vld [vmem:[%s4870_s0 + $0x228] sm:$0xff]  ;;  %v232_v29 = vmax.f32 %v100_v24, 0.0  ;;  %v3096_v34 = vld [vmem:[%s4871_s1 + $0x9c] ss:$36 sps:$4 sm:$0xff]   ;;  %v117_v41 = vld [vmem:[%s4870_s0 + $0x330] sm:$0xff] }
  0x24   :  { %2692 = vmatpush3.bf16.msra.mxu0 %v286_v44  ;;  %v216_v31 = vmax.f32 %v84_v27, 0.0  ;;  %v329_v35 = vpack.c.bf16 %v248_v23, %v247_v22  ;;  %v118_v42 = vld [vmem:[%s4870_s0 + $0x338] sm:$0xff]  ;;  %v249_v44 = vmax.f32 %v117_v41, 0.0  ;;  %v338_v46 = vpack.c.bf16 %v266_v43, %v265_v40  ;;  %v101_v48 = vld [vmem:[%s4870_s0 + $0x2b0] sm:$0xff]  ;;  %v3102_v60 = vld [vmem:[%s4871_s1 + $0xe4] ss:$36 sps:$4 sm:$0xff]  }
  0x25   :  { %2780 = vmatpush3.bf16.msra.mxu1 %v302_v49  ;;  %2853 = vmatprep.subr.bf16.mxu0 %v319_v52  ;;  %v321_v36 = vpack.c.bf16 %v232_v29, %v231_v25  ;;  %v250_v45 = vmax.f32 %v118_v42, 0.0  ;;  %v102_v49 = vld [vmem:[%s4870_s0 + $0x2b8] sm:$0xff]  ;;  %v3098_v50 = vld [vmem:[%s4871_s1 + $0x90] ss:$36 sps:$4 sm:$0xff]   ;;  %v233_v51 = vmax.f32 %v101_v48, 0.0  ;;  %v119_v1 = vld [vmem:[%s4870_s0 + $0x340] sm:$0xff] }
  0x26   :  { %2941 = vmatprep.subr.bf16.mxu1 %v335_v54  ;;  %v313_v38 = vpack.c.bf16 %v216_v31, %v215_v30  ;;  %v234_v52 = vmax.f32 %v102_v49, 0.0  ;;  %v85_v53 = vld [vmem:[%s4870_s0 + $0x230] sm:$0xff]  ;;  %v86_v54 = vld [vmem:[%s4870_s0 + $0x238] sm:$0xff]  ;;  %v251_v4 = vmax.f32 %v119_v1, 0.0  ;;  %v103_v6 = vld [vmem:[%s4870_s0 + $0x2c0] sm:$0xff] }
  0x27   :  { %1075 = vmatmul.mubr.bf16.vlgmr.msra.gmra.mrb[0].mxu0 %v3082_v58  ;;  %v330_v47 = vpack.c.bf16 %v250_v45, %v249_v44  ;;  %v3099_v55 = vld [vmem:[%s4871_s1 + $0x98] ss:$36 sps:$4 sm:$0xff]   ;;  %v217_v56 = vmax.f32 %v85_v53, 0.0  ;;  %v218_v57 = vmax.f32 %v86_v54, 0.0  ;;  %v235_v9 = vmax.f32 %v103_v6, 0.0  ;;  %v137_v21 = vld [vmem:[%s4870_s0 + $0x3d0] sm:$0xff] }
  0x28   :  { %1204 = vmatmul.mubr.bf16.vlgmr.msra.gmra.mrb[0].mxu1 %v3085_v61  ;;  %2854 = vmatpush3.bf16.msra.mxu0 %v311_v62  ;;  %v3100_v58 = vld [vmem:[%s4871_s1 + $0xdc] ss:$36 sps:$4 sm:$0xff]   ;;  %v322_v59 = vpack.c.bf16 %v234_v52, %v233_v51  ;;  %v3106_v18 = vld [vmem:[%s4871_s1 + $0x124] ss:$36 sps:$4 sm:$0xff]   ;;  %v121_v23 = vld [vmem:[%s4870_s0 + $0x350] sm:$0xff]  ;;  %v269_v24 = vmax.f32 %v137_v21, 0.0 }
  0x29   :  { %2942 = vmatpush3.bf16.msra.mxu1 %v327_v2  ;;  %1082 = vmatprep.mubr.bf16.mxu0 %v3088_v63  ;;  %v314_v61 = vpack.c.bf16 %v218_v57, %v217_v56  ;;  %v135_v62 = vld [vmem:[%s4870_s0 + $0x3c0] sm:$0xff]  ;;  %v136_v63 = vld [vmem:[%s4870_s0 + $0x3c8] sm:$0xff]  ;;  %v138_v22 = vld [vmem:[%s4870_s0 + $0x3d8] sm:$0xff]  ;;  %v253_v27 = vmax.f32 %v121_v23, 0.0 }
  0x2a   :  { %1211 = vmatprep.mubr.bf16.mxu1 %v3090_v7  ;;  %2943 = vmatprep.subr.bf16.mxu1 %v336_v8  ;;  %v267_v0 = vmax.f32 %v135_v62, 0.0  ;;  %v120_v2 = vld [vmem:[%s4870_s0 + $0x348] sm:$0xff]  ;;  %v268_v3 = vmax.f32 %v136_v63, 0.0  ;;  %v87_v8 = vld [vmem:[%s4870_s0 + $0x240] sm:$0xff]  ;;  %v270_v25 = vmax.f32 %v138_v22, 0.0  ;;  %v122_v26 = vld [vmem:[%s4870_s0 + $0x358] sm:$0xff] }
  0x2b   :  { %2855 = vmatprep.subr.bf16.mxu0 %v320_v11  ;;  %v252_v5 = vmax.f32 %v120_v2, 0.0  ;;  %v104_v7 = vld [vmem:[%s4870_s0 + $0x2c8] sm:$0xff]  ;;  %v3105_v17 = vld [vmem:[%s4871_s1 + $0xe0] ss:$36 sps:$4 sm:$0xff]   ;;  %v254_v29 = vmax.f32 %v122_v26, 0.0  ;;  %v105_v31 = vld [vmem:[%s4870_s0 + $0x2d0] sm:$0xff] }
  0x2c   :  { %2856 = vmatpush3.bf16.msra.mxu0 %v312_v12  ;;  %v236_v10 = vmax.f32 %v104_v7, 0.0  ;;  %v88_v11 = vld [vmem:[%s4870_s0 + $0x248] sm:$0xff]  ;;  %v219_v12 = vmax.f32 %v87_v8, 0.0  ;;  %v339_v13 = vpack.c.bf16 %v268_v3, %v267_v0  ;;  %v340_v30 = vpack.c.bf16 %v270_v25, %v269_v24  ;;  %v90_v37 = vld [vmem:[%s4870_s0 + $0x258] sm:$0xff]  ;;  %v107_v52 = vld [vmem:[%s4870_s0 + $0x2e0] sm:$0xff] }
  0x2d   :  { %2944 = vmatpush3.bf16.msra.mxu1 %v328_v16  ;;  %2857 = vmatprep.subr.bf16.mxu0 %v321_v36  ;;  %v331_v14 = vpack.c.bf16 %v252_v5, %v251_v4  ;;  %v3104_v16 = vld [vmem:[%s4871_s1 + $0xd8] ss:$36 sps:$4 sm:$0xff]   ;;  %v89_v36 = vld [vmem:[%s4870_s0 + $0x250] sm:$0xff]  ;;  %v222_v41 = vmax.f32 %v90_v37, 0.0  ;;  %v3111_v42 = vld [vmem:[%s4871_s1 + $0x128] ss:$36 sps:$4 sm:$0xff]  }
  0x2e   :  { %2945 = vmatprep.subr.bf16.mxu1 %v337_v28  ;;  %v323_v19 = vpack.c.bf16 %v236_v10, %v235_v9  ;;  %v3108_v28 = vld [vmem:[%s4871_s1 + $0x12c] ss:$36 sps:$4 sm:$0xff]   ;;  %v221_v40 = vmax.f32 %v89_v36, 0.0  ;;  %v3114_v44 = vld [vmem:[%s4871_s1 + $0x174] ss:$36 sps:$4 sm:$0xff]   ;;  %v239_v56 = vmax.f32 %v107_v52, 0.0 }
  0x2f   :  { %1083 = vmatmul.mubr.bf16.gmra.mrb[4].mxu0 %v3092_v15  ;;  %v220_v15 = vmax.f32 %v88_v11, 0.0  ;;  %v3112_v43 = vld [vmem:[%s4871_s1 + $0x16c] ss:$36 sps:$4 sm:$0xff]   ;;  %v91_v57 = vld [vmem:[%s4870_s0 + $0x260] sm:$0xff]  ;;  %v142_v3 = vld [vmem:[%s4870_s0 + $0x3f8] sm:$0xff] }
  0x30   :  { %1212 = vmatmul.mubr.bf16.gmra.mrb[4].mxu1 %v3093_v32  ;;  %1090 = vmatprep.mubr.bf16.mxu0 %v3094_v33  ;;  %v106_v32 = vld [vmem:[%s4870_s0 + $0x2d8] sm:$0xff]  ;;  %v332_v33 = vpack.c.bf16 %v254_v29, %v253_v27  ;;  %v316_v45 = vpack.c.bf16 %v222_v41, %v221_v40  ;;  %v124_v51 = vld [vmem:[%s4870_s0 + $0x368] sm:$0xff]  ;;  %v141_v2 = vld [vmem:[%s4870_s0 + $0x3f0] sm:$0xff]  ;;  %v274_v7 = vmax.f32 %v142_v3, 0.0 }
  0x31   :  { %1219 = vmatprep.mubr.bf16.mxu1 %v3096_v34  ;;  %2946 = vmatpush3.bf16.msra.mxu1 %v329_v35  ;;  %v315_v20 = vpack.c.bf16 %v220_v15, %v219_v12  ;;  %v237_v34 = vmax.f32 %v105_v31, 0.0  ;;  %v238_v35 = vmax.f32 %v106_v32, 0.0  ;;  %v256_v54 = vmax.f32 %v124_v51, 0.0  ;;  %v125_v5 = vld [vmem:[%s4870_s0 + $0x370] sm:$0xff]  ;;  %v126_v6 = vld [vmem:[%s4870_s0 + $0x378] sm:$0xff]  ;;  %v143_v26 = vld [vmem:[%s4870_s0 + $0x400] sm:$0xff] }
  0x32   :  { %2858 = vmatpush3.bf16.msra.mxu0 %v313_v38  ;;  %2947 = vmatprep.subr.bf16.mxu1 %v338_v46  ;;  %v3110_v38 = vld [vmem:[%s4871_s1 + $0x120] ss:$36 sps:$4 sm:$0xff]   ;;  %v273_v4 = vmax.f32 %v141_v2, 0.0  ;;  %v257_v8 = vmax.f32 %v125_v5, 0.0  ;;  %v258_v9 = vmax.f32 %v126_v6, 0.0  ;;  %v109_v15 = vld [vmem:[%s4870_s0 + $0x2f0] sm:$0xff] }
  0x33   :  { %2859 = vmatprep.subr.bf16.mxu0 %v322_v59  ;;  %v324_v39 = vpack.c.bf16 %v238_v35, %v237_v34  ;;  %v139_v46 = vld [vmem:[%s4870_s0 + $0x3e0] sm:$0xff]  ;;  %v3116_v10 = vld [vmem:[%s4871_s1 + $0x168] ss:$36 sps:$4 sm:$0xff]   ;;  %v3117_v11 = vld [vmem:[%s4871_s1 + $0x170] ss:$36 sps:$4 sm:$0xff]  }
  0x34   :  { %v271_v48 = vmax.f32 %v139_v46, 0.0  ;;  %v3118_v12 = vld [vmem:[%s4871_s1 + $0x1b4] ss:$36 sps:$4 sm:$0xff]   ;;  %v144_v27 = vld [vmem:[%s4870_s0 + $0x408] sm:$0xff]  ;;  %v3124_v32 = vld [vmem:[%s4871_s1 + $0x1fc] ss:$36 sps:$4 sm:$0xff]  }
  0x35   :  { %2948 = vmatpush3.bf16.msra.mxu1 %v330_v47  ;;  %v140_v47 = vld [vmem:[%s4870_s0 + $0x3e8] sm:$0xff]  ;;  %v94_v21 = vld [vmem:[%s4870_s0 + $0x278] sm:$0xff]  ;;  %v276_v29 = vmax.f32 %v144_v27, 0.0  ;;  %v3129_v36 = vld [vmem:[%s4871_s1 + $0x200] ss:$36 sps:$4 sm:$0xff]  }
  0x36   :  { %2860 = vmatpush3.bf16.msra.mxu0 %v314_v61  ;;  %2949 = vmatprep.subr.bf16.mxu1 %v339_v13  ;;  %v272_v49 = vmax.f32 %v140_v47, 0.0  ;;  %v223_v61 = vmax.f32 %v91_v57, 0.0  ;;  %v342_v13 = vpack.c.bf16 %v274_v7, %v273_v4  ;;  %v226_v23 = vmax.f32 %v94_v21, 0.0  ;;  %v3123_v31 = vld [vmem:[%s4871_s1 + $0x1b8] ss:$36 sps:$4 sm:$0xff]  }
  0x37   :  { %1091 = vmatmul.mubr.bf16.gmra.mrb[8].mxu0 %v3098_v50  ;;  %2861 = vmatprep.subr.bf16.mxu0 %v323_v19  ;;  %v123_v50 = vld [vmem:[%s4870_s0 + $0x360] sm:$0xff]  ;;  %v3128_v35 = vld [vmem:[%s4871_s1 + $0x1f8] ss:$36 sps:$4 sm:$0xff]   ;;  %v3135_v40 = vld [vmem:[%s4871_s1 + $0x248] ss:$36 sps:$4 sm:$0xff]  }
  0x38   :  { %1220 = vmatmul.mubr.bf16.gmra.mrb[8].mxu1 %v3099_v55  ;;  %1098 = vmatprep.mubr.bf16.mxu0 %v3100_v58  ;;  %v255_v53 = vmax.f32 %v123_v50, 0.0  ;;  %v108_v55 = vld [vmem:[%s4870_s0 + $0x2e8] sm:$0xff]  ;;  %v341_v59 = vpack.c.bf16 %v272_v49, %v271_v48  ;;  %v3144_v46 = vld [vmem:[%s4871_s1 + $0x2dc] ss:$36 sps:$4 sm:$0xff]   ;;  %v3146_v47 = vld [vmem:[%s4871_s1 + $0x2d0] ss:$36 sps:$4 sm:$0xff]  }
  0x39   :  { %1227 = vmatprep.mubr.bf16.mxu1 %v3102_v60  ;;  %2950 = vmatpush3.bf16.msra.mxu1 %v331_v14  ;;  %v92_v58 = vld [vmem:[%s4870_s0 + $0x268] sm:$0xff]  ;;  %v240_v60 = vmax.f32 %v108_v55, 0.0  ;;  %v334_v14 = vpack.c.bf16 %v258_v9, %v257_v8  ;;  %v3147_v48 = vld [vmem:[%s4871_s1 + $0x2d8] ss:$36 sps:$4 sm:$0xff]   ;;  %v3153_v52 = vld [vmem:[%s4871_s1 + $0x320] ss:$36 sps:$4 sm:$0xff]  }
  0x3a   :  { %2862 = vmatpush3.bf16.msra.mxu0 %v315_v20  ;;  %2951 = vmatprep.subr.bf16.mxu1 %v340_v30  ;;  %v224_v62 = vmax.f32 %v92_v58, 0.0  ;;  %v333_v63 = vpack.c.bf16 %v256_v54, %v255_v53  ;;  %v93_v20 = vld [vmem:[%s4870_s0 + $0x270] sm:$0xff]  ;;  %v3126_v34 = vld [vmem:[%s4871_s1 + $0x204] ss:$36 sps:$4 sm:$0xff]   ;;  %v3148_v49 = vld [vmem:[%s4871_s1 + $0x31c] ss:$36 sps:$4 sm:$0xff]  }
  0x3b   :  { %2863 = vmatprep.subr.bf16.mxu0 %v324_v39  ;;  %v325_v0 = vpack.c.bf16 %v240_v60, %v239_v56  ;;  %v225_v22 = vmax.f32 %v93_v20, 0.0  ;;  %v3122_v30 = vld [vmem:[%s4871_s1 + $0x1b0] ss:$36 sps:$4 sm:$0xff]   ;;  %v3130_v37 = vld [vmem:[%s4871_s1 + $0x244] ss:$36 sps:$4 sm:$0xff]   ;;  %v146_v56 = vld [vmem:[%s4870_s0 + $0x418] sm:$0xff] }
  0x3c   :  { %v317_v1 = vpack.c.bf16 %v224_v62, %v223_v61  ;;  %v3134_v39 = vld [vmem:[%s4871_s1 + $0x240] ss:$36 sps:$4 sm:$0xff]   ;;  %v3136_v41 = vld [vmem:[%s4871_s1 + $0x28c] ss:$36 sps:$4 sm:$0xff]   ;;  %v3152_v51 = vld [vmem:[%s4871_s1 + $0x318] ss:$36 sps:$4 sm:$0xff]  }
  0x3d   :  { %2952 = vmatpush3.bf16.msra.mxu1 %v332_v33  ;;  %v318_v25 = vpack.c.bf16 %v226_v23, %v225_v22  ;;  %v3150_v50 = vld [vmem:[%s4871_s1 + $0x324] ss:$36 sps:$4 sm:$0xff]   ;;  %v3156_v53 = vld [vmem:[%s4871_s1 + $0x14] ss:$36 sps:$4 sm:$0xff]   ;;  %v3159_v54 = vld [vmem:[%s4871_s1 + $0x1c] ss:$36 sps:$4 sm:$0xff]  }
  0x3e   :  { %2864 = vmatpush3.bf16.msra.mxu0 %v316_v45  ;;  %2953 = vmatprep.subr.bf16.mxu1 %v341_v59  ;;  %v3142_v45 = vld [vmem:[%s4871_s1 + $0x2d4] ss:$36 sps:$4 sm:$0xff]   ;;  %v278_v58 = vmax.f32 %v146_v56, 0.0  ;;  %v3160_v61 = vld [vmem:[%s4871_s1 + $0x5c] ss:$36 sps:$4 sm:$0xff]  }
  0x3f   :  { %1099 = vmatmul.mubr.bf16.gmra.mrb[12].mxu0 %v3104_v16  ;;  %2865 = vmatprep.subr.bf16.mxu0 %v325_v0  ;;  %v110_v16 = vld [vmem:[%s4870_s0 + $0x2f8] sm:$0xff]  ;;  %v145_v55 = vld [vmem:[%s4870_s0 + $0x410] sm:$0xff]  ;;  %v3162_v62 = vld [vmem:[%s4871_s1 + $0x64] ss:$36 sps:$4 sm:$0xff]  }
  0x40   :  { %1228 = vmatmul.mubr.bf16.gmra.mrb[12].mxu1 %v3105_v17  ;;  %1106 = vmatprep.mubr.bf16.mxu0 %v3106_v18  ;;  %v3120_v17 = vld [vmem:[%s4871_s1 + $0x1bc] ss:$36 sps:$4 sm:$0xff]   ;;  %v241_v18 = vmax.f32 %v109_v15, 0.0  ;;  %v242_v19 = vmax.f32 %v110_v16, 0.0  ;;  %v277_v57 = vmax.f32 %v145_v55, 0.0 }
  0x41   :  { %1235 = vmatprep.mubr.bf16.mxu1 %v3108_v28  ;;  %2954 = vmatpush3.bf16.msra.mxu1 %v333_v63  ;;  %v275_v28 = vmax.f32 %v143_v26, 0.0  ;;  %v3154_v59 = vld [vmem:[%s4871_s1 + $0x10] ss:$36 sps:$4 sm:$0xff]   ;;  %v3157_v60 = vld [vmem:[%s4871_s1 + $0x18] ss:$36 sps:$4 sm:$0xff]  }
  0x42   :  { %2866 = vmatpush3.bf16.msra.mxu0 %v317_v1  ;;  %2955 = vmatprep.subr.bf16.mxu1 %v342_v13  ;;  %v326_v24 = vpack.c.bf16 %v242_v19, %v241_v18  ;;  %v344_v63 = vpack.c.bf16 %v278_v58, %v277_v57  ;;  %v3164_v0 = vld [vmem:[%s4871_s1 + $0x58] ss:$36 sps:$4 sm:$0xff]   ;;  %v3165_v1 = vld [vmem:[%s4871_s1 + $0x60] ss:$36 sps:$4 sm:$0xff]   ;;  %v3168_v3 = vld [vmem:[%s4871_s1 + $0xac] ss:$36 sps:$4 sm:$0xff]  }
  0x43   :  { %v343_v33 = vpack.c.bf16 %v276_v29, %v275_v28  ;;  %v3166_v2 = vld [vmem:[%s4871_s1 + $0xa4] ss:$36 sps:$4 sm:$0xff]   ;;  %v3172_v6 = vld [vmem:[%s4871_s1 + $0xec] ss:$36 sps:$4 sm:$0xff]   ;;  %v3174_v7 = vld [vmem:[%s4871_s1 + $0xf4] ss:$36 sps:$4 sm:$0xff]  }
  0x44   :  { %2867 = vmatprep.subr.bf16.mxu0 %v326_v24  ;;  %v3170_v4 = vld [vmem:[%s4871_s1 + $0xa0] ss:$36 sps:$4 sm:$0xff]   ;;  %v3171_v5 = vld [vmem:[%s4871_s1 + $0xa8] ss:$36 sps:$4 sm:$0xff]   ;;  %v3177_v9 = vld [vmem:[%s4871_s1 + $0xf0] ss:$36 sps:$4 sm:$0xff]  }
  0x45   :  { %2956 = vmatpush3.bf16.msra.mxu1 %v334_v14  ;;  %v3176_v8 = vld [vmem:[%s4871_s1 + $0xe8] ss:$36 sps:$4 sm:$0xff]   ;;  %v3183_v13 = vld [vmem:[%s4871_s1 + $0x138] ss:$36 sps:$4 sm:$0xff]   ;;  %v3194_v20 = vld [vmem:[%s4871_s1 + $0x1c0] ss:$36 sps:$4 sm:$0xff]  }
  0x46   :  { %2868 = vmatpush3.bf16.msra.mxu0 %v318_v25  ;;  %3071 = vmatprep.subr.bf16.mxu1 %v343_v33  ;;  %v3184_v14 = vld [vmem:[%s4871_s1 + $0x17c] ss:$36 sps:$4 sm:$0xff]   ;;  %v3186_v15 = vld [vmem:[%s4871_s1 + $0x184] ss:$36 sps:$4 sm:$0xff]   ;;  %v3192_v19 = vld [vmem:[%s4871_s1 + $0x1cc] ss:$36 sps:$4 sm:$0xff]  }
  0x47   :  { %1107 = vmatmul.mubr.bf16.gmra.mrb[16].mxu0 %v3110_v38  ;;  %3043 = vmatprep.subr.bf16.mxu0 %v343_v33  ;;  %v3132_v38 = vld [vmem:[%s4871_s1 + $0x24c] ss:$36 sps:$4 sm:$0xff]   ;;  %v3188_v16 = vld [vmem:[%s4871_s1 + $0x178] ss:$36 sps:$4 sm:$0xff]   ;;  %v3190_v18 = vld [vmem:[%s4871_s1 + $0x1c4] ss:$36 sps:$4 sm:$0xff]  }
  0x48   :  { %1236 = vmatmul.mubr.bf16.gmra.mrb[16].mxu1 %v3111_v42  ;;  %1114 = vmatprep.mubr.bf16.mxu0 %v3112_v43  ;;  %v3138_v42 = vld [vmem:[%s4871_s1 + $0x294] ss:$36 sps:$4 sm:$0xff]   ;;  %v3140_v43 = vld [vmem:[%s4871_s1 + $0x288] ss:$36 sps:$4 sm:$0xff]   ;;  %v3204_v27 = vld [vmem:[%s4871_s1 + $0x25c] ss:$36 sps:$4 sm:$0xff]  }
  0x49   :  { %1243 = vmatprep.mubr.bf16.mxu1 %v3114_v44  ;;  %v3141_v44 = vld [vmem:[%s4871_s1 + $0x290] ss:$36 sps:$4 sm:$0xff]   ;;  %v3195_v21 = vld [vmem:[%s4871_s1 + $0x1c8] ss:$36 sps:$4 sm:$0xff]   ;;  %v3207_v29 = vld [vmem:[%s4871_s1 + $0x258] ss:$36 sps:$4 sm:$0xff]  }
  0x4a   :  { %v3196_v22 = vld [vmem:[%s4871_s1 + $0x20c] ss:$36 sps:$4 sm:$0xff]   ;;  %v3198_v23 = vld [vmem:[%s4871_s1 + $0x214] ss:$36 sps:$4 sm:$0xff]  }
  0x4b   :  { %v3200_v24 = vld [vmem:[%s4871_s1 + $0x208] ss:$36 sps:$4 sm:$0xff]   ;;  %v3201_v25 = vld [vmem:[%s4871_s1 + $0x210] ss:$36 sps:$4 sm:$0xff]  }
  0x4c   :  { %v3202_v26 = vld [vmem:[%s4871_s1 + $0x254] ss:$36 sps:$4 sm:$0xff]  }
  0x4d   :  { %v3206_v28 = vld [vmem:[%s4871_s1 + $0x250] ss:$36 sps:$4 sm:$0xff]  }
  0x4f   :  { %1115 = vmatmul.mubr.bf16.gmra.mrb[20].mxu0 %v3116_v10  ;;  %v3178_v10 = vld [vmem:[%s4871_s1 + $0x134] ss:$36 sps:$4 sm:$0xff]  }
  0x50   :  { %1244 = vmatmul.mubr.bf16.gmra.mrb[20].mxu1 %v3117_v11  ;;  %1122 = vmatprep.mubr.bf16.mxu0 %v3118_v12  ;;  %v3180_v11 = vld [vmem:[%s4871_s1 + $0x13c] ss:$36 sps:$4 sm:$0xff]   ;;  %v3182_v12 = vld [vmem:[%s4871_s1 + $0x130] ss:$36 sps:$4 sm:$0xff]  }
  0x51   :  { %1251 = vmatprep.mubr.bf16.mxu1 %v3120_v17  ;;  %v3189_v17 = vld [vmem:[%s4871_s1 + $0x180] ss:$36 sps:$4 sm:$0xff]  }
  0x57   :  { %1123 = vmatmul.mubr.bf16.gmra.mrb[24].mxu0 %v3122_v30  ;;  %v3208_v30 = vld [vmem:[%s4871_s1 + $0x29c] ss:$36 sps:$4 sm:$0xff]  }
  0x58   :  { %1252 = vmatmul.mubr.bf16.gmra.mrb[24].mxu1 %v3123_v31  ;;  %1130 = vmatprep.mubr.bf16.mxu0 %v3124_v32  ;;  %v3210_v31 = vld [vmem:[%s4871_s1 + $0x2a4] ss:$36 sps:$4 sm:$0xff]   ;;  %v3212_v32 = vld [vmem:[%s4871_s1 + $0x298] ss:$36 sps:$4 sm:$0xff]  }
  0x59   :  { %1259 = vmatprep.mubr.bf16.mxu1 %v3126_v34  ;;  %v3214_v34 = vld [vmem:[%s4871_s1 + $0x2e4] ss:$36 sps:$4 sm:$0xff]  }
  0x5f   :  { %1131 = vmatmul.mubr.bf16.gmra.mrb[28].mxu0 %v3128_v35  ;;  %v3216_v35 = vld [vmem:[%s4871_s1 + $0x2ec] ss:$36 sps:$4 sm:$0xff]  }
  0x60   :  { %1260 = vmatmul.mubr.bf16.gmra.mrb[28].mxu1 %v3129_v36  ;;  %1138 = vmatprep.mubr.bf16.mxu0 %v3130_v37  ;;  %v3218_v36 = vld [vmem:[%s4871_s1 + $0x2e0] ss:$36 sps:$4 sm:$0xff]   ;;  %v3219_v37 = vld [vmem:[%s4871_s1 + $0x2e8] ss:$36 sps:$4 sm:$0xff]  }
  0x61   :  { %1267 = vmatprep.mubr.bf16.mxu1 %v3132_v38  ;;  %v3220_v38 = vld [vmem:[%s4871_s1 + $0x32c] ss:$36 sps:$4 sm:$0xff]  }
  0x67   :  { %1139 = vmatmul.mubr.bf16.gmra.mrb[32].mxu0 %v3134_v39  ;;  %v3222_v39 = vld [vmem:[%s4871_s1 + $0x334] ss:$36 sps:$4 sm:$0xff]  }
  0x68   :  { %1268 = vmatmul.mubr.bf16.gmra.mrb[32].mxu1 %v3135_v40  ;;  %1146 = vmatprep.mubr.bf16.mxu0 %v3136_v41  ;;  %v3224_v40 = vld [vmem:[%s4871_s1 + $0x328] ss:$36 sps:$4 sm:$0xff]   ;;  %v3225_v41 = vld [vmem:[%s4871_s1 + $0x330] ss:$36 sps:$4 sm:$0xff]  }
  0x69   :  { %1275 = vmatprep.mubr.bf16.mxu1 %v3138_v42  ;;  %v3226_v42 = vld [vmem:[%s4871_s1 + $0x20] ss:$36 sps:$4 sm:$0xff]  }
  0x6f   :  { %1147 = vmatmul.mubr.bf16.gmra.mrb[36].mxu0 %v3140_v43  ;;  %v3227_v43 = vld [vmem:[%s4871_s1 + $0x1d0] ss:$36 sps:$4 sm:$0xff]  }
  0x70   :  { %1276 = vmatmul.mubr.bf16.gmra.mrb[36].mxu1 %v3141_v44  ;;  %1154 = vmatprep.mubr.bf16.mxu0 %v3142_v45  ;;  %v3228_v44 = vld [vmem:[%s4871_s1 + $0x68] ss:$36 sps:$4 sm:$0xff]   ;;  %v3229_v45 = vld [vmem:[%s4871_s1 + $0x218] ss:$36 sps:$4 sm:$0xff]  }
  0x71   :  { %1283 = vmatprep.mubr.bf16.mxu1 %v3144_v46  ;;  %v3230_v46 = vld [vmem:[%s4871_s1 + $0xb0] ss:$36 sps:$4 sm:$0xff]  }
  0x77   :  { %1155 = vmatmul.mubr.bf16.gmra.mrb[40].mxu0 %v3146_v47  ;;  %v3231_v47 = vld [vmem:[%s4871_s1 + $0x260] ss:$36 sps:$4 sm:$0xff]  }
  0x78   :  { %1284 = vmatmul.mubr.bf16.gmra.mrb[40].mxu1 %v3147_v48  ;;  %1162 = vmatprep.mubr.bf16.mxu0 %v3148_v49  ;;  %v3232_v48 = vld [vmem:[%s4871_s1 + $0xf8] ss:$36 sps:$4 sm:$0xff]   ;;  %v3233_v49 = vld [vmem:[%s4871_s1 + $0x2a8] ss:$36 sps:$4 sm:$0xff]  }
  0x79   :  { %1291 = vmatprep.mubr.bf16.mxu1 %v3150_v50  ;;  %v3234_v50 = vld [vmem:[%s4871_s1 + $0x140] ss:$36 sps:$4 sm:$0xff]  }
  0x7f   :  { %1163 = vmatmul.mubr.bf16.gmra.mrb[44].mxu0 %v3152_v51  ;;  %v3235_v51 = vld [vmem:[%s4871_s1 + $0x2f0] ss:$36 sps:$4 sm:$0xff]  }
  0x80   :  { %1292 = vmatmul.mubr.bf16.gmra.mrb[44].mxu1 %v3153_v52  ;;  %1332 = vmatprep.mubr.bf16.mxu0 %v3156_v53  ;;  %v3236_v52 = vld [vmem:[%s4871_s1 + $0x188] ss:$36 sps:$4 sm:$0xff]   ;;  %v3237_v53 = vld [vmem:[%s4871_s1 + $0x338] ss:$36 sps:$4 sm:$0xff]  }
  0x81   :  { %1461 = vmatprep.mubr.bf16.mxu1 %v3159_v54 }
  0x87   :  { %1333 = vmatmul.mubr.bf16.vlgmr.msra.gmra.mrb[48].mxu0 %v3154_v59 }
  0x88   :  { %1462 = vmatmul.mubr.bf16.vlgmr.msra.gmra.mrb[48].mxu1 %v3157_v60  ;;  %3044 = vmatpush3.bf16.msra.mxu0 %v343_v33 }
  0x89   :  { %3073 = vmatpush3.bf16.msra.mxu1 %v343_v33  ;;  %1340 = vmatprep.mubr.bf16.mxu0 %v3160_v61  ;;  %v3213_v33 = vld [vmem:[%s4871_s1 + $0x2a0] ss:$36 sps:$4 sm:$0xff]  }
  0x8a   :  { %1469 = vmatprep.mubr.bf16.mxu1 %v3162_v62  ;;  %3072 = vmatprep.subr.bf16.mxu1 %v344_v63 }
  0x8b   :  { %3045 = vmatprep.subr.bf16.mxu0 %v344_v63 }
  0x8c   :  { %3046 = vmatpush3.bf16.msra.mxu0 %v344_v63 }
  0x8d   :  { %3074 = vmatpush3.bf16.msra.mxu1 %v344_v63 }
  0x8f   :  { %1341 = vmatmul.mubr.bf16.gmra.mrb[52].mxu0 %v3164_v0 }
  0x90   :  { %1470 = vmatmul.mubr.bf16.gmra.mrb[52].mxu1 %v3165_v1  ;;  %1348 = vmatprep.mubr.bf16.mxu0 %v3166_v2 }
  0x91   :  { %1477 = vmatprep.mubr.bf16.mxu1 %v3168_v3 }
  0x97   :  { %1349 = vmatmul.mubr.bf16.gmra.mrb[56].mxu0 %v3170_v4 }
  0x98   :  { %1478 = vmatmul.mubr.bf16.gmra.mrb[56].mxu1 %v3171_v5  ;;  %1356 = vmatprep.mubr.bf16.mxu0 %v3172_v6 }
  0x99   :  { %1485 = vmatprep.mubr.bf16.mxu1 %v3174_v7 }
  0x9f   :  { %1357 = vmatmul.mubr.bf16.gmra.mrb[60].mxu0 %v3176_v8 }
  0xa0   :  { %1486 = vmatmul.mubr.bf16.gmra.mrb[60].mxu1 %v3177_v9  ;;  %1364 = vmatprep.mubr.bf16.mxu0 %v3178_v10 }
  0xa1   :  { %1493 = vmatprep.mubr.bf16.mxu1 %v3180_v11 }
  0xa7   :  { %1365 = vmatmul.mubr.bf16.gmra.mrb[64].mxu0 %v3182_v12 }
  0xa8   :  { %1494 = vmatmul.mubr.bf16.gmra.mrb[64].mxu1 %v3183_v13  ;;  %1372 = vmatprep.mubr.bf16.mxu0 %v3184_v14 }
  0xa9   :  { %1501 = vmatprep.mubr.bf16.mxu1 %v3186_v15 }
  0xaf   :  { %1373 = vmatmul.mubr.bf16.gmra.mrb[68].mxu0 %v3188_v16 }
  0xb0   :  { %1502 = vmatmul.mubr.bf16.gmra.mrb[68].mxu1 %v3189_v17  ;;  %1380 = vmatprep.mubr.bf16.mxu0 %v3190_v18 }
  0xb1   :  { %1509 = vmatprep.mubr.bf16.mxu1 %v3192_v19 }
  0xb7   :  { %1381 = vmatmul.mubr.bf16.gmra.mrb[72].mxu0 %v3194_v20 }
  0xb8   :  { %1510 = vmatmul.mubr.bf16.gmra.mrb[72].mxu1 %v3195_v21  ;;  %1388 = vmatprep.mubr.bf16.mxu0 %v3196_v22 }
  0xb9   :  { %1517 = vmatprep.mubr.bf16.mxu1 %v3198_v23 }
  0xbf   :  { %1389 = vmatmul.mubr.bf16.gmra.mrb[76].mxu0 %v3200_v24 }
  0xc0   :  { %1518 = vmatmul.mubr.bf16.gmra.mrb[76].mxu1 %v3201_v25  ;;  %1396 = vmatprep.mubr.bf16.mxu0 %v3202_v26 }
  0xc1   :  { %1525 = vmatprep.mubr.bf16.mxu1 %v3204_v27 }
  0xc7   :  { %1397 = vmatmul.mubr.bf16.gmra.mrb[80].mxu0 %v3206_v28 }
  0xc8   :  { %1526 = vmatmul.mubr.bf16.gmra.mrb[80].mxu1 %v3207_v29  ;;  %1404 = vmatprep.mubr.bf16.mxu0 %v3208_v30 }
  0xc9   :  { %1533 = vmatprep.mubr.bf16.mxu1 %v3210_v31 }
  0xcf   :  { %1405 = vmatmul.mubr.bf16.gmra.mrb[84].mxu0 %v3212_v32 }
  0xd0   :  { %1534 = vmatmul.mubr.bf16.gmra.mrb[84].mxu1 %v3213_v33  ;;  %1412 = vmatprep.mubr.bf16.mxu0 %v3214_v34 }
  0xd1   :  { %1541 = vmatprep.mubr.bf16.mxu1 %v3216_v35 }
  0xd7   :  { %1413 = vmatmul.mubr.bf16.gmra.mrb[88].mxu0 %v3218_v36 }
  0xd8   :  { %1542 = vmatmul.mubr.bf16.gmra.mrb[88].mxu1 %v3219_v37  ;;  %1420 = vmatprep.mubr.bf16.mxu0 %v3220_v38 }
  0xd9   :  { %1549 = vmatprep.mubr.bf16.mxu1 %v3222_v39 }
  0xdf   :  { %1421 = vmatmul.mubr.bf16.gmra.mrb[92].mxu0 %v3224_v40 }
  0xe0   :  { %1550 = vmatmul.mubr.bf16.gmra.mrb[92].mxu1 %v3225_v41  ;;  %3047 = vmatprep.mubr.msk.bf16.mxu0 %vm1005_vm0, %v3226_v42 }
  0xe1   :  { %3059 = vmatprep.mubr.msk.bf16.mxu1 %vm1005_vm0, %v3227_v43 }
  0xe7   :  { %3048 = vmatmul.mubr.msk.bf16.vlgmr.msra.gmra.mrb[96].mxu0 %vm1005_vm0, %v3228_v44 }
  0xe8   :  { %3060 = vmatmul.mubr.msk.bf16.vlgmr.msra.gmra.mrb[96].mxu1 %vm1005_vm0, %v3229_v45  ;;  %3051 = vmatprep.mubr.msk.bf16.mxu0 %vm1005_vm0, %v3230_v46 }
  0xe9   :  { %3063 = vmatprep.mubr.msk.bf16.mxu1 %vm1005_vm0, %v3231_v47 }
  0xef   :  { %3052 = vmatmul.mubr.msk.bf16.gmra.mrb[100].mxu0 %vm1005_vm0, %v3232_v48 }
  0xf0   :  { %3064 = vmatmul.mubr.msk.bf16.gmra.mrb[100].mxu1 %vm1005_vm0, %v3233_v49  ;;  %3055 = vmatprep.mubr.msk.bf16.mxu0 %vm1005_vm0, %v3234_v50 }
  0xf1   :  { %3067 = vmatprep.mubr.msk.bf16.mxu1 %vm1005_vm0, %v3235_v51 }
  0xf7   :  { %3056 = vmatmul.mubr.msk.bf16.gmra.mrb[104].mxu0 %vm1005_vm0, %v3236_v52 }
  0xf8   :  { %3068 = vmatmul.mubr.msk.bf16.gmra.mrb[104].mxu1 %vm1005_vm0, %v3237_v53 }
  0xfa   :  { %v2693_v54 = vpop.f32.mrb[0].mxu0 }
  0xfb   :  { %v2781_v55 = vpop.f32.mrb[0].mxu1  ;;  %v2694_v56 = vpop.f32.mrb[1].mxu0 }
  0xfc   :  { %v2695_v57 = vadd.f32 %v2694_v56, %v2693_v54  ;;  %v2782_v58 = vpop.f32.mrb[1].mxu1  ;;  %v2696_v59 = vpop.f32.mrb[2].mxu0 }
  0xfd   :  { %v2783_v60 = vadd.f32 %v2782_v58, %v2781_v55  ;;  %v2784_v61 = vpop.f32.mrb[2].mxu1  ;;  %v2697_v62 = vpop.f32.mrb[3].mxu0 }
  0xfe   :  { %v2698_v63 = vadd.f32 %v2697_v62, %v2696_v59  ;;  %v2785_v0 = vpop.f32.mrb[3].mxu1 }
  0xff   :  { %v4041_v1 = vadd.f32 %v2783_v60, %v2695_v57  ;;  %v2786_v2 = vadd.f32 %v2785_v0, %v2784_v61 }
 0x101   :  { %v4043_v3 = vadd.f32 %v2786_v2, %v2698_v63 }
 0x102   :  { %v2699_v4 = vpop.f32.mrb[4].mxu0 }
 0x103   :  { %v2787_v5 = vpop.f32.mrb[4].mxu1  ;;  %v2700_v6 = vpop.f32.mrb[5].mxu0 }
 0x104   :  { %v2701_v7 = vadd.f32 %v2700_v6, %v2699_v4  ;;  %v2788_v8 = vpop.f32.mrb[5].mxu1  ;;  %v2702_v9 = vpop.f32.mrb[6].mxu0 }
 0x105   :  { %v2789_v10 = vadd.f32 %v2788_v8, %v2787_v5  ;;  %v2790_v11 = vpop.f32.mrb[6].mxu1  ;;  %v2703_v12 = vpop.f32.mrb[7].mxu0 }
 0x106   :  { %v2704_v13 = vadd.f32 %v2703_v12, %v2702_v9  ;;  %v2791_v14 = vpop.f32.mrb[7].mxu1 }
 0x107   :  { %v4045_v15 = vadd.f32 %v2789_v10, %v2701_v7  ;;  %v2792_v16 = vadd.f32 %v2791_v14, %v2790_v11 }
 0x109   :  { %v4047_v17 = vadd.f32 %v2792_v16, %v2704_v13 }
 0x10a   :  { %v2705_v18 = vpop.f32.mrb[8].mxu0 }
 0x10b   :  { %v2793_v19 = vpop.f32.mrb[8].mxu1  ;;  %v2706_v20 = vpop.f32.mrb[9].mxu0 }
 0x10c   :  { %v2707_v21 = vadd.f32 %v2706_v20, %v2705_v18  ;;  %v2794_v22 = vpop.f32.mrb[9].mxu1  ;;  %v2708_v23 = vpop.f32.mrb[10].mxu0 }
 0x10d   :  { %v2795_v24 = vadd.f32 %v2794_v22, %v2793_v19  ;;  %v2796_v25 = vpop.f32.mrb[10].mxu1  ;;  %v2709_v26 = vpop.f32.mrb[11].mxu0 }
 0x10e   :  { %v2710_v27 = vadd.f32 %v2709_v26, %v2708_v23  ;;  %v2797_v28 = vpop.f32.mrb[11].mxu1 }
 0x10f   :  { %v4049_v29 = vadd.f32 %v2795_v24, %v2707_v21  ;;  %v2798_v30 = vadd.f32 %v2797_v28, %v2796_v25 }
 0x111   :  { %v4051_v31 = vadd.f32 %v2798_v30, %v2710_v27 }
 0x112   :  { %v2711_v32 = vpop.f32.mrb[12].mxu0 }
 0x113   :  { %v2799_v33 = vpop.f32.mrb[12].mxu1  ;;  %v2712_v34 = vpop.f32.mrb[13].mxu0 }
 0x114   :  { %v2713_v35 = vadd.f32 %v2712_v34, %v2711_v32  ;;  %v2800_v36 = vpop.f32.mrb[13].mxu1  ;;  %v2714_v37 = vpop.f32.mrb[14].mxu0 }
 0x115   :  { %v2801_v38 = vadd.f32 %v2800_v36, %v2799_v33  ;;  %v2802_v39 = vpop.f32.mrb[14].mxu1  ;;  %v2715_v40 = vpop.f32.mrb[15].mxu0 }
 0x116   :  { %v2716_v41 = vadd.f32 %v2715_v40, %v2714_v37  ;;  %v2803_v42 = vpop.f32.mrb[15].mxu1 }
 0x117   :  { %v4053_v43 = vadd.f32 %v2801_v38, %v2713_v35  ;;  %v2804_v44 = vadd.f32 %v2803_v42, %v2802_v39 }
 0x119   :  { %v4055_v45 = vadd.f32 %v2804_v44, %v2716_v41 }
 0x11a   :  { %v2717_v46 = vpop.f32.mrb[16].mxu0 }
 0x11b   :  { %v2805_v47 = vpop.f32.mrb[16].mxu1  ;;  %v2718_v48 = vpop.f32.mrb[17].mxu0 }
 0x11c   :  { %v2719_v49 = vadd.f32 %v2718_v48, %v2717_v46  ;;  %v2806_v50 = vpop.f32.mrb[17].mxu1  ;;  %v2720_v51 = vpop.f32.mrb[18].mxu0 }
 0x11d   :  { %v2807_v52 = vadd.f32 %v2806_v50, %v2805_v47  ;;  %v2808_v53 = vpop.f32.mrb[18].mxu1  ;;  %v2721_v54 = vpop.f32.mrb[19].mxu0 }
 0x11e   :  { %v2722_v55 = vadd.f32 %v2721_v54, %v2720_v51  ;;  %v2809_v56 = vpop.f32.mrb[19].mxu1 }
 0x11f   :  { %v4057_v57 = vadd.f32 %v2807_v52, %v2719_v49  ;;  %v2810_v58 = vadd.f32 %v2809_v56, %v2808_v53 }
 0x121   :  { %v4059_v59 = vadd.f32 %v2810_v58, %v2722_v55 }
 0x122   :  { %v2723_v60 = vpop.f32.mrb[20].mxu0 }
 0x123   :  { %v2811_v61 = vpop.f32.mrb[20].mxu1  ;;  %v2724_v62 = vpop.f32.mrb[21].mxu0 }
 0x124   :  { %v2725_v63 = vadd.f32 %v2724_v62, %v2723_v60  ;;  %v2812_v0 = vpop.f32.mrb[21].mxu1  ;;  %v2726_v2 = vpop.f32.mrb[22].mxu0 }
 0x125   :  { %v2813_v4 = vadd.f32 %v2812_v0, %v2811_v61  ;;  %v2814_v5 = vpop.f32.mrb[22].mxu1  ;;  %v2727_v6 = vpop.f32.mrb[23].mxu0 }
 0x126   :  { %v2728_v7 = vadd.f32 %v2727_v6, %v2726_v2  ;;  %v2815_v8 = vpop.f32.mrb[23].mxu1 }
 0x127   :  { %v4061_v9 = vadd.f32 %v2813_v4, %v2725_v63  ;;  %v2816_v10 = vadd.f32 %v2815_v8, %v2814_v5 }
 0x129   :  { %v4063_v11 = vadd.f32 %v2816_v10, %v2728_v7 }
 0x12a   :  { %v2729_v12 = vpop.f32.mrb[24].mxu0 }
 0x12b   :  { %v2817_v13 = vpop.f32.mrb[24].mxu1  ;;  %v2730_v14 = vpop.f32.mrb[25].mxu0 }
 0x12c   :  { %v2731_v16 = vadd.f32 %v2730_v14, %v2729_v12  ;;  %v2818_v18 = vpop.f32.mrb[25].mxu1  ;;  %v2732_v19 = vpop.f32.mrb[26].mxu0 }
 0x12d   :  { %v2819_v20 = vadd.f32 %v2818_v18, %v2817_v13  ;;  %v2820_v21 = vpop.f32.mrb[26].mxu1  ;;  %v2733_v22 = vpop.f32.mrb[27].mxu0 }
 0x12e   :  { %v2734_v23 = vadd.f32 %v2733_v22, %v2732_v19  ;;  %v2821_v24 = vpop.f32.mrb[27].mxu1 }
 0x12f   :  { %v4065_v25 = vadd.f32 %v2819_v20, %v2731_v16  ;;  %v2822_v26 = vadd.f32 %v2821_v24, %v2820_v21 }
 0x131   :  { %v4067_v27 = vadd.f32 %v2822_v26, %v2734_v23 }
 0x132   :  { %v2735_v28 = vpop.f32.mrb[28].mxu0 }
 0x133   :  { %v2823_v30 = vpop.f32.mrb[28].mxu1  ;;  %v2736_v32 = vpop.f32.mrb[29].mxu0 }
 0x134   :  { %v2737_v33 = vadd.f32 %v2736_v32, %v2735_v28  ;;  %v2824_v34 = vpop.f32.mrb[29].mxu1  ;;  %v2738_v35 = vpop.f32.mrb[30].mxu0 }
 0x135   :  { %v2825_v36 = vadd.f32 %v2824_v34, %v2823_v30  ;;  %v2826_v37 = vpop.f32.mrb[30].mxu1  ;;  %v2739_v38 = vpop.f32.mrb[31].mxu0 }
 0x136   :  { %v2740_v39 = vadd.f32 %v2739_v38, %v2738_v35  ;;  %v2827_v40 = vpop.f32.mrb[31].mxu1 }
 0x137   :  { %v4069_v41 = vadd.f32 %v2825_v36, %v2737_v33  ;;  %v2828_v42 = vadd.f32 %v2827_v40, %v2826_v37 }
 0x139   :  { %v4071_v44 = vadd.f32 %v2828_v42, %v2740_v39 }
 0x13a   :  { %v2741_v46 = vpop.f32.mrb[32].mxu0 }
 0x13b   :  { %v2829_v47 = vpop.f32.mrb[32].mxu1  ;;  %v2742_v48 = vpop.f32.mrb[33].mxu0 }
 0x13c   :  { %v2743_v49 = vadd.f32 %v2742_v48, %v2741_v46  ;;  %v2830_v50 = vpop.f32.mrb[33].mxu1  ;;  %v2744_v51 = vpop.f32.mrb[34].mxu0 }
 0x13d   :  { %v2831_v52 = vadd.f32 %v2830_v50, %v2829_v47  ;;  %v2832_v53 = vpop.f32.mrb[34].mxu1  ;;  %v2745_v54 = vpop.f32.mrb[35].mxu0 }
 0x13e   :  { %v2746_v55 = vadd.f32 %v2745_v54, %v2744_v51  ;;  %v2833_v56 = vpop.f32.mrb[35].mxu1 }
 0x13f   :  { %v4073_v58 = vadd.f32 %v2831_v52, %v2743_v49  ;;  %v2834_v60 = vadd.f32 %v2833_v56, %v2832_v53 }
 0x141   :  { %v4075_v61 = vadd.f32 %v2834_v60, %v2746_v55 }
 0x142   :  { %v2747_v62 = vpop.f32.mrb[36].mxu0 }
 0x143   :  { %v2835_v63 = vpop.f32.mrb[36].mxu1  ;;  %v2748_v0 = vpop.f32.mrb[37].mxu0 }
 0x144   :  { %v2749_v2 = vadd.f32 %v2748_v0, %v2747_v62  ;;  %v2836_v4 = vpop.f32.mrb[37].mxu1  ;;  %v2750_v5 = vpop.f32.mrb[38].mxu0 }
 0x145   :  { %v2837_v6 = vadd.f32 %v2836_v4, %v2835_v63  ;;  %v2838_v7 = vpop.f32.mrb[38].mxu1  ;;  %v2751_v8 = vpop.f32.mrb[39].mxu0 }
 0x146   :  { %v2752_v10 = vadd.f32 %v2751_v8, %v2750_v5  ;;  %v2839_v12 = vpop.f32.mrb[39].mxu1 }
 0x147   :  { %v4077_v13 = vadd.f32 %v2837_v6, %v2749_v2  ;;  %v2840_v14 = vadd.f32 %v2839_v12, %v2838_v7 }
 0x149   :  { %v4079_v16 = vadd.f32 %v2840_v14, %v2752_v10 }
 0x14a   :  { %v2753_v18 = vpop.f32.mrb[40].mxu0 }
 0x14b   :  { %v2841_v19 = vpop.f32.mrb[40].mxu1  ;;  %v2754_v20 = vpop.f32.mrb[41].mxu0 }
 0x14c   :  { %v2755_v21 = vadd.f32 %v2754_v20, %v2753_v18  ;;  %v2842_v22 = vpop.f32.mrb[41].mxu1  ;;  %v2756_v23 = vpop.f32.mrb[42].mxu0 }
 0x14d   :  { %v2843_v24 = vadd.f32 %v2842_v22, %v2841_v19  ;;  %v2844_v26 = vpop.f32.mrb[42].mxu1  ;;  %v2757_v28 = vpop.f32.mrb[43].mxu0 }
 0x14e   :  { %v2758_v30 = vadd.f32 %v2757_v28, %v2756_v23  ;;  %v2845_v32 = vpop.f32.mrb[43].mxu1 }
 0x14f   :  { %v4081_v33 = vadd.f32 %v2843_v24, %v2755_v21  ;;  %v2846_v34 = vadd.f32 %v2845_v32, %v2844_v26 }
 0x151   :  { %v4083_v35 = vadd.f32 %v2846_v34, %v2758_v30 }
 0x152   :  { %v2759_v36 = vpop.f32.mrb[44].mxu0 }
 0x153   :  { %v2847_v37 = vpop.f32.mrb[44].mxu1  ;;  %v2760_v38 = vpop.f32.mrb[45].mxu0 }
 0x154   :  { %v2761_v39 = vadd.f32 %v2760_v38, %v2759_v36  ;;  %v2848_v40 = vpop.f32.mrb[45].mxu1  ;;  %v2762_v42 = vpop.f32.mrb[46].mxu0 }
 0x155   :  { %v2849_v46 = vadd.f32 %v2848_v40, %v2847_v37  ;;  %v2850_v47 = vpop.f32.mrb[46].mxu1  ;;  %v2763_v48 = vpop.f32.mrb[47].mxu0 }
 0x156   :  { %v2764_v49 = vadd.f32 %v2763_v48, %v2762_v42  ;;  %v2851_v50 = vpop.f32.mrb[47].mxu1 }
 0x157   :  { %v4085_v51 = vadd.f32 %v2849_v46, %v2761_v39  ;;  %v2852_v52 = vadd.f32 %v2851_v50, %v2850_v47 }
 0x159   :  { %v4087_v53 = vadd.f32 %v2852_v52, %v2764_v49 }
 0x15a   :  { %v2869_v54 = vpop.f32.mrb[48].mxu0 }
 0x15b   :  { %v2957_v55 = vpop.f32.mrb[48].mxu1  ;;  %v2870_v56 = vpop.f32.mrb[49].mxu0 }
 0x15c   :  { %v2871_v60 = vadd.f32 %v2870_v56, %v2869_v54  ;;  %v2958_v62 = vpop.f32.mrb[49].mxu1  ;;  %v2872_v63 = vpop.f32.mrb[50].mxu0 }
 0x15d   :  { %v2959_v0 = vadd.f32 %v2958_v62, %v2957_v55  ;;  %v2960_v2 = vpop.f32.mrb[50].mxu1  ;;  %v2873_v4 = vpop.f32.mrb[51].mxu0 }
 0x15e   :  { %v1335_v5 = vadd.f32 %v2871_v60, %v4041_v1  ;;  %v2874_v6 = vadd.f32 %v2873_v4, %v2872_v63  ;;  %v2961_v7 = vpop.f32.mrb[51].mxu1 }
 0x15f   :  { %v2962_v8 = vadd.f32 %v2961_v7, %v2960_v2 }
 0x160   :  { %v1338_v10 = vadd.f32 %v2874_v6, %v4043_v3  ;;  %v4091_v12 = vadd.f32 %v2959_v0, %v1335_v5 }
 0x162   :  { %v2875_v14 = vpop.f32.mrb[52].mxu0  ;;  %v4093_v18 = vadd.f32 %v2962_v8, %v1338_v10 }
 0x163   :  { %v2963_v19 = vpop.f32.mrb[52].mxu1  ;;  %v2876_v20 = vpop.f32.mrb[53].mxu0 }
 0x164   :  { %v2877_v21 = vadd.f32 %v2876_v20, %v2875_v14  ;;  %v2964_v22 = vpop.f32.mrb[53].mxu1  ;;  %v2878_v23 = vpop.f32.mrb[54].mxu0 }
 0x165   :  { %v2965_v24 = vadd.f32 %v2964_v22, %v2963_v19  ;;  %v2966_v26 = vpop.f32.mrb[54].mxu1  ;;  %v2879_v28 = vpop.f32.mrb[55].mxu0 }
 0x166   :  { %v1343_v1 = vadd.f32 %v2877_v21, %v4045_v15  ;;  %v2880_v30 = vadd.f32 %v2879_v28, %v2878_v23  ;;  %v2967_v32 = vpop.f32.mrb[55].mxu1 }
 0x167   :  { %v2968_v34 = vadd.f32 %v2967_v32, %v2966_v26 }
 0x168   :  { %v1346_v3 = vadd.f32 %v2880_v30, %v4047_v17  ;;  %v4097_v36 = vadd.f32 %v2965_v24, %v1343_v1 }
 0x16a   :  { %v2881_v37 = vpop.f32.mrb[56].mxu0  ;;  %v4099_v38 = vadd.f32 %v2968_v34, %v1346_v3 }
 0x16b   :  { %v2969_v39 = vpop.f32.mrb[56].mxu1  ;;  %v2882_v40 = vpop.f32.mrb[57].mxu0 }
 0x16c   :  { %v2883_v42 = vadd.f32 %v2882_v40, %v2881_v37  ;;  %v2970_v46 = vpop.f32.mrb[57].mxu1  ;;  %v2884_v47 = vpop.f32.mrb[58].mxu0 }
 0x16d   :  { %v2971_v48 = vadd.f32 %v2970_v46, %v2969_v39  ;;  %v2972_v49 = vpop.f32.mrb[58].mxu1  ;;  %v2885_v50 = vpop.f32.mrb[59].mxu0 }
 0x16e   :  { %v1351_v15 = vadd.f32 %v2883_v42, %v4049_v29  ;;  %v2886_v52 = vadd.f32 %v2885_v50, %v2884_v47  ;;  %v2973_v54 = vpop.f32.mrb[59].mxu1 }
 0x16f   :  { %v2974_v55 = vadd.f32 %v2973_v54, %v2972_v49 }
 0x170   :  { %v1354_v17 = vadd.f32 %v2886_v52, %v4051_v31  ;;  %v4103_v56 = vadd.f32 %v2971_v48, %v1351_v15 }
 0x172   :  { %v2887_v60 = vpop.f32.mrb[60].mxu0  ;;  %v4105_v62 = vadd.f32 %v2974_v55, %v1354_v17 }
 0x173   :  { %v2975_v63 = vpop.f32.mrb[60].mxu1  ;;  %v2888_v0 = vpop.f32.mrb[61].mxu0 }
 0x174   :  { %v2889_v2 = vadd.f32 %v2888_v0, %v2887_v60  ;;  %v2976_v4 = vpop.f32.mrb[61].mxu1  ;;  %v2890_v5 = vpop.f32.mrb[62].mxu0 }
 0x175   :  { %v2977_v6 = vadd.f32 %v2976_v4, %v2975_v63  ;;  %v2978_v7 = vpop.f32.mrb[62].mxu1  ;;  %v2891_v8 = vpop.f32.mrb[63].mxu0 }
 0x176   :  { %v1359_v29 = vadd.f32 %v2889_v2, %v4053_v43  ;;  %v2892_v10 = vadd.f32 %v2891_v8, %v2890_v5  ;;  %v2979_v14 = vpop.f32.mrb[63].mxu1 }
 0x177   :  { %v2980_v19 = vadd.f32 %v2979_v14, %v2978_v7 }
 0x178   :  { %v1362_v31 = vadd.f32 %v2892_v10, %v4055_v45  ;;  %v4109_v20 = vadd.f32 %v2977_v6, %v1359_v29 }
 0x17a   :  { %v2893_v21 = vpop.f32.mrb[64].mxu0  ;;  %v4111_v22 = vadd.f32 %v2980_v19, %v1362_v31 }
 0x17b   :  { %v2981_v23 = vpop.f32.mrb[64].mxu1  ;;  %v2894_v24 = vpop.f32.mrb[65].mxu0 }
 0x17c   :  { %v2895_v26 = vadd.f32 %v2894_v24, %v2893_v21  ;;  %v2982_v28 = vpop.f32.mrb[65].mxu1  ;;  %v2896_v1 = vpop.f32.mrb[66].mxu0 }
 0x17d   :  { %v2983_v30 = vadd.f32 %v2982_v28, %v2981_v23  ;;  %v2984_v32 = vpop.f32.mrb[66].mxu1  ;;  %v2897_v34 = vpop.f32.mrb[67].mxu0 }
 0x17e   :  { %v1367_v43 = vadd.f32 %v2895_v26, %v4057_v57  ;;  %v2898_v3 = vadd.f32 %v2897_v34, %v2896_v1  ;;  %v2985_v37 = vpop.f32.mrb[67].mxu1 }
 0x17f   :  { %v2986_v39 = vadd.f32 %v2985_v37, %v2984_v32 }
 0x180   :  { %v1370_v45 = vadd.f32 %v2898_v3, %v4059_v59  ;;  %v4115_v40 = vadd.f32 %v2983_v30, %v1367_v43 }
 0x182   :  { %v2899_v42 = vpop.f32.mrb[68].mxu0  ;;  %v4117_v46 = vadd.f32 %v2986_v39, %v1370_v45 }
 0x183   :  { %v2987_v47 = vpop.f32.mrb[68].mxu1  ;;  %v2900_v48 = vpop.f32.mrb[69].mxu0 }
 0x184   :  { %v2901_v49 = vadd.f32 %v2900_v48, %v2899_v42  ;;  %v2988_v50 = vpop.f32.mrb[69].mxu1  ;;  %v2902_v15 = vpop.f32.mrb[70].mxu0 }
 0x185   :  { %v2989_v52 = vadd.f32 %v2988_v50, %v2987_v47  ;;  %v2990_v54 = vpop.f32.mrb[70].mxu1  ;;  %v2903_v55 = vpop.f32.mrb[71].mxu0 }
 0x186   :  { %v1375_v57 = vadd.f32 %v2901_v49, %v4061_v9  ;;  %v2904_v17 = vadd.f32 %v2903_v55, %v2902_v15  ;;  %v2991_v60 = vpop.f32.mrb[71].mxu1 }
 0x187   :  { %v2992_v63 = vadd.f32 %v2991_v60, %v2990_v54 }
 0x188   :  { %v1378_v59 = vadd.f32 %v2904_v17, %v4063_v11  ;;  %v4121_v0 = vadd.f32 %v2989_v52, %v1375_v57 }
 0x18a   :  { %v2905_v2 = vpop.f32.mrb[72].mxu0  ;;  %v4123_v4 = vadd.f32 %v2992_v63, %v1378_v59 }
 0x18b   :  { %v2993_v5 = vpop.f32.mrb[72].mxu1  ;;  %v2906_v6 = vpop.f32.mrb[73].mxu0 }
 0x18c   :  { %v2907_v7 = vadd.f32 %v2906_v6, %v2905_v2  ;;  %v2994_v8 = vpop.f32.mrb[73].mxu1  ;;  %v2908_v29 = vpop.f32.mrb[74].mxu0 }
 0x18d   :  { %v2995_v10 = vadd.f32 %v2994_v8, %v2993_v5  ;;  %v2996_v14 = vpop.f32.mrb[74].mxu1  ;;  %v2909_v19 = vpop.f32.mrb[75].mxu0 }
 0x18e   :  { %v1383_v9 = vadd.f32 %v2907_v7, %v4065_v25  ;;  %v2910_v31 = vadd.f32 %v2909_v19, %v2908_v29  ;;  %v2997_v21 = vpop.f32.mrb[75].mxu1 }
 0x18f   :  { %v2998_v23 = vadd.f32 %v2997_v21, %v2996_v14 }
 0x190   :  { %v1386_v11 = vadd.f32 %v2910_v31, %v4067_v27  ;;  %v4127_v24 = vadd.f32 %v2995_v10, %v1383_v9 }
 0x192   :  { %v2911_v26 = vpop.f32.mrb[76].mxu0  ;;  %v4129_v28 = vadd.f32 %v2998_v23, %v1386_v11 }
 0x193   :  { %v2999_v1 = vpop.f32.mrb[76].mxu1  ;;  %v2912_v30 = vpop.f32.mrb[77].mxu0 }
 0x194   :  { %v2913_v32 = vadd.f32 %v2912_v30, %v2911_v26  ;;  %v3000_v34 = vpop.f32.mrb[77].mxu1  ;;  %v2914_v43 = vpop.f32.mrb[78].mxu0 }
 0x195   :  { %v3001_v3 = vadd.f32 %v3000_v34, %v2999_v1  ;;  %v3002_v37 = vpop.f32.mrb[78].mxu1  ;;  %v2915_v39 = vpop.f32.mrb[79].mxu0 }
 0x196   :  { %v1391_v25 = vadd.f32 %v2913_v32, %v4069_v41  ;;  %v2916_v45 = vadd.f32 %v2915_v39, %v2914_v43  ;;  %v3003_v42 = vpop.f32.mrb[79].mxu1 }
 0x197   :  { %v3004_v47 = vadd.f32 %v3003_v42, %v3002_v37 }
 0x198   :  { %v1394_v27 = vadd.f32 %v2916_v45, %v4071_v44  ;;  %v4133_v48 = vadd.f32 %v3001_v3, %v1391_v25 }
 0x19a   :  { %v2917_v49 = vpop.f32.mrb[80].mxu0  ;;  %v4135_v50 = vadd.f32 %v3004_v47, %v1394_v27 }
 0x19b   :  { %v3005_v15 = vpop.f32.mrb[80].mxu1  ;;  %v2918_v52 = vpop.f32.mrb[81].mxu0 }
 0x19c   :  { %v2919_v54 = vadd.f32 %v2918_v52, %v2917_v49  ;;  %v3006_v55 = vpop.f32.mrb[81].mxu1  ;;  %v2920_v57 = vpop.f32.mrb[82].mxu0 }
 0x19d   :  { %v3007_v17 = vadd.f32 %v3006_v55, %v3005_v15  ;;  %v3008_v60 = vpop.f32.mrb[82].mxu1  ;;  %v2921_v63 = vpop.f32.mrb[83].mxu0 }
 0x19e   :  { %v1399_v41 = vadd.f32 %v2919_v54, %v4073_v58  ;;  %v2922_v59 = vadd.f32 %v2921_v63, %v2920_v57  ;;  %v3009_v2 = vpop.f32.mrb[83].mxu1 }
 0x19f   :  { %v3010_v5 = vadd.f32 %v3009_v2, %v3008_v60 }
 0x1a0   :  { %v1402_v44 = vadd.f32 %v2922_v59, %v4075_v61  ;;  %v4139_v6 = vadd.f32 %v3007_v17, %v1399_v41 }
 0x1a2   :  { %v2923_v7 = vpop.f32.mrb[84].mxu0  ;;  %v4141_v8 = vadd.f32 %v3010_v5, %v1402_v44 }
 0x1a3   :  { %v3011_v29 = vpop.f32.mrb[84].mxu1  ;;  %v2924_v10 = vpop.f32.mrb[85].mxu0 }
 0x1a4   :  { %v2925_v14 = vadd.f32 %v2924_v10, %v2923_v7  ;;  %v3012_v19 = vpop.f32.mrb[85].mxu1  ;;  %v2926_v9 = vpop.f32.mrb[86].mxu0 }
 0x1a5   :  { %v3013_v31 = vadd.f32 %v3012_v19, %v3011_v29  ;;  %v3014_v21 = vpop.f32.mrb[86].mxu1  ;;  %v2927_v23 = vpop.f32.mrb[87].mxu0 }
 0x1a6   :  { %v1407_v58 = vadd.f32 %v2925_v14, %v4077_v13  ;;  %v2928_v11 = vadd.f32 %v2927_v23, %v2926_v9  ;;  %v3015_v26 = vpop.f32.mrb[87].mxu1 }
 0x1a7   :  { %v3016_v1 = vadd.f32 %v3015_v26, %v3014_v21 }
 0x1a8   :  { %v1410_v61 = vadd.f32 %v2928_v11, %v4079_v16  ;;  %v4145_v30 = vadd.f32 %v3013_v31, %v1407_v58 }
 0x1aa   :  { %v2929_v32 = vpop.f32.mrb[88].mxu0  ;;  %v4147_v34 = vadd.f32 %v3016_v1, %v1410_v61 }
 0x1ab   :  { %v3017_v43 = vpop.f32.mrb[88].mxu1  ;;  %v2930_v3 = vpop.f32.mrb[89].mxu0 }
 0x1ac   :  { %v2931_v37 = vadd.f32 %v2930_v3, %v2929_v32  ;;  %v3018_v39 = vpop.f32.mrb[89].mxu1  ;;  %v2932_v25 = vpop.f32.mrb[90].mxu0 }
 0x1ad   :  { %v3019_v45 = vadd.f32 %v3018_v39, %v3017_v43  ;;  %v3020_v42 = vpop.f32.mrb[90].mxu1  ;;  %v2933_v47 = vpop.f32.mrb[91].mxu0 }
 0x1ae   :  { %v1415_v13 = vadd.f32 %v2931_v37, %v4081_v33  ;;  %v2934_v27 = vadd.f32 %v2933_v47, %v2932_v25  ;;  %v3021_v49 = vpop.f32.mrb[91].mxu1 }
 0x1af   :  { %v3022_v15 = vadd.f32 %v3021_v49, %v3020_v42 }
 0x1b0   :  { %v1418_v16 = vadd.f32 %v2934_v27, %v4083_v35  ;;  %v4151_v52 = vadd.f32 %v3019_v45, %v1415_v13 }
 0x1b2   :  { %v2935_v54 = vpop.f32.mrb[92].mxu0  ;;  %v4153_v55 = vadd.f32 %v3022_v15, %v1418_v16 }
 0x1b3   :  { %v3023_v57 = vpop.f32.mrb[92].mxu1  ;;  %v2936_v17 = vpop.f32.mrb[93].mxu0 }
 0x1b4   :  { %v2937_v60 = vadd.f32 %v2936_v17, %v2935_v54  ;;  %v3024_v63 = vpop.f32.mrb[93].mxu1  ;;  %v2938_v41 = vpop.f32.mrb[94].mxu0 }
 0x1b5   :  { %v3025_v59 = vadd.f32 %v3024_v63, %v3023_v57  ;;  %v3026_v2 = vpop.f32.mrb[94].mxu1  ;;  %v2939_v5 = vpop.f32.mrb[95].mxu0 }
 0x1b6   :  { %v1423_v33 = vadd.f32 %v2937_v60, %v4085_v51  ;;  %v2940_v44 = vadd.f32 %v2939_v5, %v2938_v41  ;;  %v3027_v7 = vpop.f32.mrb[95].mxu1 }
 0x1b7   :  { %v3028_v29 = vadd.f32 %v3027_v7, %v3026_v2 }
 0x1b8   :  { %v1426_v35 = vadd.f32 %v2940_v44, %v4087_v53  ;;  %v1552_v10 = vadd.f32 %v3025_v59, %v1423_v33 }
 0x1ba   :  { %v3049_v14 = vpop.f32.mrb[96].mxu0  ;;  %v4157_v19 = vadd.f32 %v3028_v29, %v1426_v35 }
 0x1bb   :  { %v4160_v9 = vadd.f32 %v3049_v14, %v4097_v36  ;;  %v3061_v31 = vpop.f32.mrb[96].mxu1  ;;  %v1592_v21 = vpop.f32.mrb[97].mxu0 }
 0x1bc   :  { %v4163_v23 = vadd.f32 %v3061_v31, %v4133_v48  ;;  %v4166_v51 = vadd.f32 %v1592_v21, %v4091_v12  ;;  %v1640_v58 = vpop.f32.mrb[97].mxu1  ;;  %v3050_v11 = vpop.f32.mrb[98].mxu0 }
 0x1bd   :  { %v4169_v53 = vadd.f32 %v1640_v58, %v4127_v24  ;;  %v4172_v26 = vadd.f32 %v3050_v11, %v4099_v38  ;;  %v3062_v1 = vpop.f32.mrb[98].mxu1  ;;  %v1595_v61 = vpop.f32.mrb[99].mxu0  ;;  %v1694_v36 = vsel %vm1687_vm1, %v4160_v9, 0.0 }
 0x1be   :  { %v4177_v32 = vadd.f32 %v3062_v1, %v4135_v50  ;;  %v4180_v48 = vadd.f32 %v1595_v61, %v4093_v18  ;;  %v1643_v12 = vpop.f32.mrb[99].mxu1  ;;  %v1730_v43 = vsel %vm1687_vm1, %v4163_v23, 0.0  ;;  %1695 = vadd.xlane.f32.xlu1 %v1694_v36  ;;  %v1688_v50 = vsel %vm1687_vm1, %v4166_v51, 0.0 }
 0x1bf   :  { %v4185_v24 = vadd.f32 %v1643_v12, %v4129_v28  ;;  %1731 = vadd.xlane.f32.xlu0 %v1730_v43  ;;  %v1697_v38 = vsel %vm1687_vm1, %v4172_v26, 0.0  ;;  %v1774_v17 = vmul.f32 %v4163_v23, %v4163_v23  ;;  %v1772_v1 = vmul.f32 %v4169_v53, %v4169_v53 }
 0x1c0   :  { %v1733_v49 = vsel %vm1687_vm1, %v4177_v32, 0.0  ;;  %v1775_v35 = vmul.f32 %v4177_v32, %v4177_v32  ;;  %v1761_v21 = vmul.f32 %v4180_v48, %v4180_v48 }
 0x1c1   :  { %v1727_v54 = vsel %vm1687_vm1, %v4185_v24, 0.0  ;;  %v1820_v36 = vsel %vm1687_vm1, %v1772_v1, 0.0 }
 0x1c2   :  { %v3053_v3 = vpop.f32.mrb[100].mxu0  ;;  %1698 = vadd.xlane.f32.xlu1 %v1697_v38  ;;  %v1829_v31 = vsel %vm1687_vm1, %v1775_v35, 0.0  ;;  %v1787_v58 = vsel %vm1687_vm1, %v1761_v21, 0.0 }
 0x1c3   :  { %v4192_v18 = vadd.f32 %v3053_v3, %v4109_v20  ;;  %v3065_v37 = vpop.f32.mrb[100].mxu1  ;;  %1689 = vadd.xlane.f32.xlu0 %v1688_v50  ;;  %v1608_v39 = vpop.f32.mrb[101].mxu0 }
 0x1c4   :  { %v4195_v25 = vadd.f32 %v3065_v37, %v4145_v30  ;;  %v4198_v28 = vadd.f32 %v1608_v39, %v4103_v56  ;;  %v1656_v45 = vpop.f32.mrb[101].mxu1  ;;  %v3054_v42 = vpop.f32.mrb[102].mxu0 }
 0x1c5   :  { %v4201_v47 = vadd.f32 %v1656_v45, %v4139_v6  ;;  %v4204_v13 = vadd.f32 %v3054_v42, %v4111_v22  ;;  %v3066_v27 = vpop.f32.mrb[102].mxu1  ;;  %v1611_v20 = vpop.f32.mrb[103].mxu0  ;;  %v1724_v6 = vsel %vm1687_vm1, %v4169_v53, 0.0  ;;  %v1762_v22 = vmul.f32 %v4160_v9, %v4160_v9 }
 0x1c6   :  { %v4209_v15 = vadd.f32 %v3066_v27, %v4147_v34  ;;  %v4212_v30 = vadd.f32 %v1611_v20, %v4105_v62  ;;  %v1659_v56 = vpop.f32.mrb[103].mxu1  ;;  %1734 = vadd.xlane.f32.xlu1 %v1733_v49  ;;  %v1763_v34 = vmul.f32 %v4172_v26, %v4172_v26  ;;  %v1706_v43 = vsel %vm1687_vm1, %v4192_v18, 0.0 }
 0x1c7   :  { %v4219_v16 = vadd.f32 %v1659_v56, %v4141_v8  ;;  %1725 = vadd.xlane.f32.xlu0 %v1724_v6  ;;  %v1790_v57 = vsel %vm1687_vm1, %v1762_v22, 0.0  ;;  %v1709_v12 = vsel %vm1687_vm1, %v4204_v13, 0.0  ;;  %v1742_v3 = vsel %vm1687_vm1, %v4195_v25, 0.0 }
 0x1c8   :  { %4885 = vst [vmem:[#allocation2_spill] sm:$0xff] %v4209_v15  ;;  %4886 = vst [vmem:[#allocation3_spill] sm:$0xff] %v4212_v30  ;;  %v1745_v38 = vsel %vm1687_vm1, %v4209_v15, 0.0  ;;  %v1703_v50 = vsel %vm1687_vm1, %v4212_v30, 0.0  ;;  %v1700_v37 = vsel %vm1687_vm1, %v4198_v28, 0.0  ;;  %v1767_v45 = vmul.f32 %v4204_v13, %v4204_v13 }
 0x1c9   :  { %4887 = vst [vmem:[#allocation4_spill] sm:$0xff] %v4219_v16  ;;  %v1739_v39 = vsel %vm1687_vm1, %v4219_v16, 0.0  ;;  %v1736_v42 = vsel %vm1687_vm1, %v4201_v47, 0.0  ;;  %v1766_v27 = vmul.f32 %v4192_v18, %v4192_v18  ;;  %v1779_v49 = vmul.f32 %v4209_v15, %v4209_v15 }
 0x1ca   :  { %v3057_v62 = vpop.f32.mrb[104].mxu0  ;;  %1728 = vadd.xlane.f32.xlu1 %v1727_v54  ;;  %v1805_v20 = vsel %vm1687_vm1, %v1767_v45, 0.0  ;;  %v1778_v6 = vmul.f32 %v4195_v25, %v4195_v25  ;;  %v1765_v54 = vmul.f32 %v4212_v30, %v4212_v30 }
 0x1cb   :  { %v4229_v60 = vadd.f32 %v3057_v62, %v4121_v0  ;;  %v3069_v63 = vpop.f32.mrb[104].mxu1  ;;  %1791 = vadd.xlane.f32.xlu0 %v1790_v57  ;;  %v1624_v8 = vpop.f32.mrb[105].mxu0  ;;  %v1793_v0 = vsel %vm1687_vm1, %v1763_v34, 0.0  ;;  %v1802_v56 = vsel %vm1687_vm1, %v1766_v27, 0.0  ;;  %v1841_v22 = vsel %vm1687_vm1, %v1779_v49, 0.0 }
 0x1cc   :  { %v4231_v41 = vadd.f32 %v3069_v63, %v1552_v10  ;;  %v4234_v59 = vadd.f32 %v1624_v8, %v4115_v40  ;;  %v1672_v2 = vpop.f32.mrb[105].mxu1  ;;  %v3058_v5 = vpop.f32.mrb[106].mxu0  ;;  %v3286_v34 = vmov 0   ;;  %v1838_v62 = vsel %vm1687_vm1, %v1778_v6, 0.0 }
 0x1cd   :  { %4888 = vst [vmem:[#allocation5_spill] sm:$0xff] %v4229_v60  ;;  %v4237_v33 = vadd.f32 %v1672_v2, %v4151_v52  ;;  %v4240_v44 = vadd.f32 %v3058_v5, %v4123_v4  ;;  %v3070_v7 = vpop.f32.mrb[106].mxu1  ;;  %v1627_v29 = vpop.f32.mrb[107].mxu0  ;;  %v1826_v52 = vsel %vm1687_vm1, %v1774_v17, 0.0  ;;  %3078 = vset.pattern.permute.xlu1 %v3286_v34  ;;  %3079 = vset.pattern.permute.xlu0 %v3286_v34  ;;  %v1799_v17 = vsel %vm1687_vm1, %v1765_v54, 0.0 }
 0x1ce   :  { %4889 = vst [vmem:[#allocation6_spill] sm:$0xff] %v4231_v41  ;;  %4890 = vst [vmem:[#allocation7_spill] sm:$0xff] %v4234_v59  ;;  %v4246_v10 = vadd.f32 %v3070_v7, %v4157_v19  ;;  %v4249_v40 = vadd.f32 %v1627_v29, %v4117_v46  ;;  %v1675_v14 = vpop.f32.mrb[107].mxu1  ;;  %1794 = vadd.xlane.f32.xlu1 %v1793_v0  ;;  %v1691_v19 = vsel %vm1687_vm1, %v4180_v48, 0.0  ;;  %v1718_v0 = vsel %vm1687_vm1, %v4229_v60, 0.0 }
 0x1cf   :  { %4891 = vst [vmem:[#allocation8_spill] sm:$0xff] %v4237_v33  ;;  %4892 = vst [vmem:[#allocation9_spill] sm:$0xff] %v4240_v44  ;;  %v4253_v4 = vadd.f32 %v1675_v14, %v4153_v55  ;;  %1827 = vadd.xlane.f32.xlu0 %v1826_v52  ;;  %v1760_v46 = vmul.f32 %v4166_v51, %v4166_v51  ;;  %v1773_v55 = vmul.f32 %v4185_v24, %v4185_v24 }
 0x1d0   :  { %4893 = vst [vmem:[#allocation10_spill] sm:$0xff] %v4246_v10  ;;  %4894 = vst [vmem:[#allocation11_spill] sm:$0xff] %v4249_v40  ;;  %v1764_v57 = vmul.f32 %v4198_v28, %v4198_v28  ;;  %v1777_v63 = vmul.f32 %v4219_v16, %v4219_v16  ;;  %v1776_v2 = vmul.f32 %v4201_v47, %v4201_v47  ;;  %v1721_v29 = vsel %vm1687_vm1, %v4240_v44, 0.0 }
 0x1d1   :  { %4895 = vst [vmem:[#allocation12_spill] sm:$0xff] %v4253_v4  ;;  %v1784_v11 = vsel %vm1687_vm1, %v1760_v46, 0.0  ;;  %v1823_v61 = vsel %vm1687_vm1, %v1773_v55, 0.0  ;;  %v1757_v35 = vsel %vm1687_vm1, %v4246_v10, 0.0  ;;  %v1754_v14 = vsel %vm1687_vm1, %v4231_v41, 0.0 }
 0x1d2   :  { %1830 = vadd.xlane.f32.xlu1 %v1829_v31  ;;  %v1796_v8 = vsel %vm1687_vm1, %v1764_v57, 0.0  ;;  %v1835_v5 = vsel %vm1687_vm1, %v1777_v63, 0.0  ;;  %v1832_v7 = vsel %vm1687_vm1, %v1776_v2, 0.0  ;;  %v1715_v52 = vsel %vm1687_vm1, %v4249_v40, 0.0 }
 0x1d3   :  { %1692 = vadd.xlane.f32.xlu0 %v1691_v19  ;;  %v1712_v31 = vsel %vm1687_vm1, %v4234_v59, 0.0  ;;  %v1751_v21 = vsel %vm1687_vm1, %v4253_v4, 0.0  ;;  %v1771_v19 = vmul.f32 %v4240_v44, %v4240_v44  ;;  %v1748_v46 = vsel %vm1687_vm1, %v4237_v33, 0.0 }
 0x1d5   :  { %v1817_v55 = vsel %vm1687_vm1, %v1771_v19, 0.0 }
 0x1d6   :  { %1788 = vadd.xlane.f32.xlu1 %v1787_v58  ;;  %v1770_v58 = vmul.f32 %v4229_v60, %v4229_v60 }
 0x1d7   :  { %1785 = vadd.xlane.f32.xlu0 %v1784_v11  ;;  %v1783_v11 = vmul.f32 %v4246_v10, %v4246_v10 }
 0x1d8   :  { %v1814_v1 = vsel %vm1687_vm1, %v1770_v58, 0.0 }
 0x1da   :  { %1824 = vadd.xlane.f32.xlu1 %v1823_v61  ;;  %v1782_v61 = vmul.f32 %v4231_v41, %v4231_v41 }
 0x1db   :  { %1821 = vadd.xlane.f32.xlu0 %v1820_v36  ;;  %v1853_v36 = vsel %vm1687_vm1, %v1783_v11, 0.0 }
 0x1de   :  { %1710 = vadd.xlane.f32.xlu1 %v1709_v12  ;;  %v1769_v12 = vmul.f32 %v4249_v40, %v4249_v40 }
 0x1df   :  { %1707 = vadd.xlane.f32.xlu0 %v1706_v43  ;;  %v1850_v43 = vsel %vm1687_vm1, %v1782_v61, 0.0 }
 0x1e2   :  { %1746 = vadd.xlane.f32.xlu1 %v1745_v38  ;;  %v1768_v38 = vmul.f32 %v4234_v59, %v4234_v59 }
 0x1e3   :  { %1743 = vadd.xlane.f32.xlu0 %v1742_v3  ;;  %v1811_v3 = vsel %vm1687_vm1, %v1769_v12, 0.0 }
 0x1e6   :  { %1704 = vadd.xlane.f32.xlu1 %v1703_v50  ;;  %v1781_v50 = vmul.f32 %v4253_v4, %v4253_v4 }
 0x1e7   :  { %1701 = vadd.xlane.f32.xlu0 %v1700_v37  ;;  %v1808_v37 = vsel %vm1687_vm1, %v1768_v38, 0.0 }
 0x1e8   :  { %v1847_v45 = vsel %vm1687_vm1, %v1781_v50, 0.0 }
 0x1ea   :  { %1740 = vadd.xlane.f32.xlu1 %v1739_v39  ;;  %v1780_v39 = vmul.f32 %v4237_v33, %v4237_v33 }
 0x1eb   :  { %1737 = vadd.xlane.f32.xlu0 %v1736_v42 }
 0x1ec   :  { %v1844_v42 = vsel %vm1687_vm1, %v1780_v39, 0.0 }
 0x1ee   :  { %1806 = vadd.xlane.f32.xlu1 %v1805_v20 }
 0x1ef   :  { %1803 = vadd.xlane.f32.xlu0 %v1802_v56 }
 0x1f2   :  { %1842 = vadd.xlane.f32.xlu1 %v1841_v22 }
 0x1f3   :  { %1839 = vadd.xlane.f32.xlu0 %v1838_v62 }
 0x1f6   :  { %1800 = vadd.xlane.f32.xlu1 %v1799_v17 }
 0x1f7   :  { %1797 = vadd.xlane.f32.xlu0 %v1796_v8 }
 0x1fa   :  { %1836 = vadd.xlane.f32.xlu1 %v1835_v5 }
 0x1fb   :  { %1833 = vadd.xlane.f32.xlu0 %v1832_v7 }
 0x1fe   :  { %1722 = vadd.xlane.f32.xlu1 %v1721_v29 }
 0x1ff   :  { %1719 = vadd.xlane.f32.xlu0 %v1718_v0 }
 0x202   :  { %1758 = vadd.xlane.f32.xlu1 %v1757_v35 }
 0x203   :  { %1755 = vadd.xlane.f32.xlu0 %v1754_v14 }
 0x206   :  { %1716 = vadd.xlane.f32.xlu1 %v1715_v52 }
 0x207   :  { %1713 = vadd.xlane.f32.xlu0 %v1712_v31 }
 0x20a   :  { %1752 = vadd.xlane.f32.xlu1 %v1751_v21 }
 0x20b   :  { %1749 = vadd.xlane.f32.xlu0 %v1748_v46 }
 0x20e   :  { %1818 = vadd.xlane.f32.xlu1 %v1817_v55 }
 0x20f   :  { %1815 = vadd.xlane.f32.xlu0 %v1814_v1 }
 0x212   :  { %1854 = vadd.xlane.f32.xlu1 %v1853_v36 }
 0x213   :  { %1851 = vadd.xlane.f32.xlu0 %v1850_v43 }
 0x216   :  { %1812 = vadd.xlane.f32.xlu1 %v1811_v3 }
 0x217   :  { %1809 = vadd.xlane.f32.xlu0 %v1808_v37 }
 0x21a   :  { %1848 = vadd.xlane.f32.xlu1 %v1847_v45 }
 0x21b   :  { %1845 = vadd.xlane.f32.xlu0 %v1844_v42 }
 0x24b   :  { %v1696_v27 = vpop.xlane.xlu1 %1695 }
 0x24c   :  { %v1732_v20 = vpop.xlane.xlu0 %1731  ;;  %v4350_v54 = vmul.f32 0.020408163, %v1696_v27 }
 0x24d   :  { %v4354_v57 = vmul.f32 0.020408163, %v1732_v20 }
 0x24e   :  { %v1907_v17 = vmul.f32 %v4350_v54, %v4350_v54 }
 0x24f   :  { %v1699_v49 = vpop.xlane.xlu1 %1698  ;;  %v1919_v7 = vmul.f32 %v4354_v57, %v4354_v57 }
 0x250   :  { %v1690_v56 = vpop.xlane.xlu0 %1689  ;;  %v4360_v31 = vmul.f32 0.020408163, %v1699_v49 }
 0x251   :  { %v4362_v21 = vmul.f32 0.020408163, %v1690_v56 }
 0x252   :  { %v1908_v1 = vmul.f32 %v4360_v31, %v4360_v31 }
 0x253   :  { %v1735_v6 = vpop.xlane.xlu1 %1734  ;;  %v1905_v61 = vmul.f32 %v4362_v21, %v4362_v21 }
 0x254   :  { %v1726_v22 = vpop.xlane.xlu0 %1725  ;;  %v4368_v36 = vmul.f32 0.020408163, %v1735_v6 }
 0x255   :  { %v4370_v43 = vmul.f32 0.020408163, %v1726_v22 }
 0x256   :  { %v1920_v27 = vmul.f32 %v4368_v36, %v4368_v36 }
 0x257   :  { %v4352_v34 = vpop.xlane.xlu1 %1728  ;;  %v1917_v49 = vmul.f32 %v4370_v43, %v4370_v43 }
 0x258   :  { %v1792_v62 = vpop.xlane.xlu0 %1791 }
 0x259   :  { %v1883_v63 = vmul.f32 0.020408163, %v1792_v62  ;;  %v4383_v62 = vld [vmem:[%s4872_s2 + $0x10] sm:$0xff] }
 0x25b   :  { %v1931_v8 = vsub.f32 %v1883_v63, %v1907_v17  ;;  %v1795_v2 = vpop.xlane.xlu1 %1794 }
 0x25c   :  { %v1828_v5 = vpop.xlane.xlu0 %1827  ;;  %v1884_v58 = vmul.f32 0.020408163, %v1795_v2 }
 0x25d   :  { %v1955_v29 = vmax.f32 %v1931_v8, 0.0  ;;  %v1895_v0 = vmul.f32 0.020408163, %v1828_v5 }
 0x25e   :  { %v1932_v37 = vsub.f32 %v1884_v58, %v1908_v1 }
 0x25f   :  { %v2003_v35 = vadd.f32 1e-05, %v1955_v29  ;;  %v1943_v14 = vsub.f32 %v1895_v0, %v1919_v7  ;;  %v1831_v52 = vpop.xlane.xlu1 %1830 }
 0x260   :  { %v1693_v19 = vpop.xlane.xlu0 %1692  ;;  %v1896_v50 = vmul.f32 0.020408163, %v1831_v52  ;;  %v1956_v8 = vmax.f32 %v1932_v37, 0.0  ;;  %v4389_v52 = vld [vmem:[%s4872_s2 + $0x70] sm:$0xff] }
 0x261   :  { %3238 = vrsqrt.f32 %v2003_v35  ;;  %v1967_v46 = vmax.f32 %v1943_v14, 0.0  ;;  %v4372_v38 = vmul.f32 0.020408163, %v1693_v19 }
 0x262   :  { %v1944_v17 = vsub.f32 %v1896_v50, %v1920_v27  ;;  %v2004_v58 = vadd.f32 1e-05, %v1956_v8 }
 0x263   :  { %v2015_v55 = vadd.f32 1e-05, %v1967_v46  ;;  %v1789_v11 = vpop.xlane.xlu1 %1788  ;;  %v1906_v56 = vmul.f32 %v4372_v38, %v4372_v38 }
 0x264   :  { %v1786_v12 = vpop.xlane.xlu0 %1785  ;;  %v1882_v39 = vmul.f32 0.020408163, %v1789_v11  ;;  %v1968_v19 = vmax.f32 %v1944_v17, 0.0 }
 0x265   :  { %3240 = vrsqrt.f32 %v2015_v55  ;;  %v1881_v3 = vmul.f32 0.020408163, %v1786_v12 }
 0x266   :  { %v1930_v2 = vsub.f32 %v1882_v39, %v1906_v56  ;;  %v2016_v50 = vadd.f32 1e-05, %v1968_v19 }
 0x267   :  { %v1929_v45 = vsub.f32 %v1881_v3, %v1905_v61  ;;  %v1825_v42 = vpop.xlane.xlu1 %1824  ;;  %v4393_v3 = vmul.f32 0.020408163, %v4352_v34 }
 0x268   :  { %v1822_v20 = vpop.xlane.xlu0 %1821  ;;  %v1954_v55 = vmax.f32 %v1930_v2, 0.0  ;;  %v1894_v39 = vmul.f32 0.020408163, %v1825_v42 }
 0x269   :  { %v1953_v6 = vmax.f32 %v1929_v45, 0.0  ;;  %v1893_v22 = vmul.f32 0.020408163, %v1822_v20  ;;  %v1918_v20 = vmul.f32 %v4393_v3, %v4393_v3 }
 0x26a   :  { %v2002_v37 = vadd.f32 1e-05, %v1954_v55 }
 0x26b   :  { %v3239_v63 = vpop.eup %3238  ;;  %v2001_v5 = vadd.f32 1e-05, %v1953_v6  ;;  %v1941_v7 = vsub.f32 %v1893_v22, %v1917_v49  ;;  %v1711_v29 = vpop.xlane.xlu1 %1710  ;;  %v4402_v49 = vld [vmem:[%s4872_s2] sm:$0xff]  ;;  %v1942_v56 = vsub.f32 %v1894_v39, %v1918_v20 }
 0x26c   :  { %v1708_v0 = vpop.xlane.xlu0 %1707  ;;  %v2051_v35 = vmul.f32 %v3239_v63, %v4383_v62  ;;  %v4412_v63 = vld [vmem:[%s4872_s2 + $0x60] sm:$0xff] }
 0x26d   :  { %3242 = vrsqrt.f32 %v2001_v5  ;;  %v1965_v14 = vmax.f32 %v1941_v7, 0.0  ;;  %v4407_v17 = vmul.f32 0.020408163, %v1708_v0  ;;  %v1966_v2 = vmax.f32 %v1942_v56, 0.0  ;;  %v4421_v0 = vld [vmem:[%s4872_s2 + $0x18] sm:$0xff] }
 0x26e   :  { %2229 = vperm.xlu1 %3078, %v2051_v35  }
 0x26f   :  { %v3241_v46 = vpop.eup %3240  ;;  %v2013_v11 = vadd.f32 1e-05, %v1965_v14  ;;  %v1747_v1 = vpop.xlane.xlu1 %1746  ;;  %v1911_v55 = vmul.f32 %v4407_v17, %v4407_v17 }
 0x270   :  { %v1744_v61 = vpop.xlane.xlu0 %1743  ;;  %v2063_v12 = vmul.f32 %v3241_v46, %v4389_v52 }
 0x271   :  { %3244 = vrsqrt.f32 %v2013_v11  ;;  %v4427_v11 = vmul.f32 0.020408163, %v1744_v61  ;;  %v2075_v61 = vmul.f32 %v2051_v35, %v4350_v54 }
 0x272   :  { %2289 = vperm.xlu1 %3078, %v2063_v12   ;;  %3246 = vrsqrt.f32 %v2004_v58  ;;  %v2087_v14 = vmul.f32 %v2063_v12, %v4354_v57  ;;  %v4423_v58 = vmul.f32 0.020408163, %v1711_v29  ;;  %v2014_v57 = vadd.f32 1e-05, %v1966_v2 }
 0x273   :  { %v4395_v45 = vpop.xlane.xlu1 %1704  ;;  %3248 = vrsqrt.f32 %v2016_v50  ;;  %v1923_v2 = vmul.f32 %v4427_v11, %v4427_v11 }
 0x274   :  { %v1702_v27 = vpop.xlane.xlu0 %1701  ;;  %3250 = vrsqrt.f32 %v2002_v37 }
 0x275   :  { %v4433_v29 = vmul.f32 0.020408163, %v1702_v27  ;;  %v4449_v27 = vld [vmem:[%s4872_s2 + $0x8] sm:$0xff]  ;;  %3252 = vrsqrt.f32 %v2014_v57 }
 0x277   :  { %v3243_v34 = vpop.eup %3242  ;;  %v4404_v6 = vpop.xlane.xlu1 %1740  ;;  %v1909_v10 = vmul.f32 %v4433_v29, %v4433_v29 }
 0x278   :  { %v1738_v22 = vpop.xlane.xlu0 %1737  ;;  %v2049_v42 = vmul.f32 %v3243_v34, %v4402_v49  ;;  %v4431_v34 = vmul.f32 0.020408163, %v1747_v1  ;;  %v4444_v1 = vld [vmem:[%s4872_s2 + $0x78] sm:$0xff] }
 0x27a   :  { %2219 = vperm.xlu0 %3079, %v2049_v42   ;;  %v2073_v44 = vmul.f32 %v2049_v42, %v4362_v21  ;;  %v4470_v42 = vmul.f32 0.020408163, %v4395_v45 }
 0x27b   :  { %v3245_v8 = vpop.eup %3244  ;;  %v1807_v5 = vpop.xlane.xlu1 %1806 }
 0x27c   :  { %v1804_v7 = vpop.xlane.xlu0 %1803  ;;  %v4416_v19 = vmul.f32 %v3245_v8, %v4412_v63  ;;  %v3247_v46 = vpop.eup %3246  ;;  %v1888_v12 = vmul.f32 0.020408163, %v1807_v5 }
 0x27d   :  { %v1887_v50 = vmul.f32 0.020408163, %v1804_v7  ;;  %v3249_v20 = vpop.eup %3248  ;;  %v2052_v8 = vmul.f32 %v3247_v46, %v4421_v0 }
 0x27e   :  { %2149 = vrot.lane.b32.xlu0 %v2087_v14, %s3287_s10  ;;  %2279 = vperm.xlu1 %3078, %v4416_v19   ;;  %v3251_v7 = vpop.eup %3250  ;;  %v1912_v14 = vmul.f32 %v4423_v58, %v4423_v58  ;;  %v2064_v41 = vmul.f32 %v3249_v20, %v4444_v1 }
 0x27f   :  { %v1935_v37 = vsub.f32 %v1887_v50, %v1911_v55  ;;  %v1843_v39 = vpop.xlane.xlu1 %1842  ;;  %v2050_v40 = vmul.f32 %v3251_v7, %v4449_v27  ;;  %v2076_v59 = vmul.f32 %v2052_v8, %v4360_v31  ;;  %v2085_v31 = vmul.f32 %v4416_v19, %v4370_v43  ;;  %v3253_v21 = vpop.eup %3252 }
 0x280   :  { %v1840_v56 = vpop.xlane.xlu0 %1839  ;;  %v1900_v54 = vmul.f32 0.020408163, %v1843_v39  ;;  %v1936_v35 = vsub.f32 %v1888_v12, %v1912_v14  ;;  %v4458_v39 = vmul.f32 0.020408163, %v1738_v22 }
 0x281   :  { %v1959_v5 = vmax.f32 %v1935_v37, 0.0  ;;  %v1899_v55 = vmul.f32 0.020408163, %v1840_v56  ;;  %v1924_v56 = vmul.f32 %v4431_v34, %v4431_v34 }
 0x282   :  { %2234 = vperm.xlu0 %3079, %v2052_v8   ;;  %2125 = vrot.lane.b32.xlu1 %v2075_v61, %s3287_s10  ;;  %v1960_v14 = vmax.f32 %v1936_v35, 0.0  ;;  %v1921_v20 = vmul.f32 %v4458_v39, %v4458_v39 }
 0x283   :  { %v2007_v46 = vadd.f32 1e-05, %v1959_v5  ;;  %v1947_v50 = vsub.f32 %v1899_v55, %v1923_v2  ;;  %v1801_v37 = vpop.xlane.xlu1 %1800  ;;  %v1948_v12 = vsub.f32 %v1900_v54, %v1924_v56  ;;  %v2074_v56 = vmul.f32 %v2050_v40, %v4372_v38 }
 0x284   :  { %v1798_v4 = vpop.xlane.xlu0 %1797 }
 0x285   :  { %3254 = vrsqrt.f32 %v2007_v46  ;;  %v1971_v61 = vmax.f32 %v1947_v50, 0.0  ;;  %v1885_v57 = vmul.f32 0.020408163, %v1798_v4  ;;  %v1972_v7 = vmax.f32 %v1948_v12, 0.0 }
 0x286   :  { %2294 = vperm.xlu0 %3079, %v2064_v41   ;;  %2224 = vperm.xlu1 %3078, %v2050_v40   ;;  %v2008_v4 = vadd.f32 1e-05, %v1960_v14  ;;  %v2088_v50 = vmul.f32 %v2064_v41, %v4368_v36  ;;  %v1886_v36 = vmul.f32 0.020408163, %v1801_v37  ;;  %v1910_v12 = vmul.f32 %v4470_v42, %v4470_v42  ;;  %v4495_v37 = vld [vmem:[%s4872_s2 + $0x90] sm:$0xff] }
 0x287   :  { %v2019_v2 = vadd.f32 1e-05, %v1971_v61  ;;  %v1933_v5 = vsub.f32 %v1885_v57, %v1909_v10  ;;  %v1837_v55 = vpop.xlane.xlu1 %1836  ;;  %v4490_v14 = vmul.f32 0.020408163, %v4404_v6 }
 0x288   :  { %v1834_v33 = vpop.xlane.xlu0 %1833  ;;  %v1934_v38 = vsub.f32 %v1886_v36, %v1910_v12 }
 0x289   :  { %3256 = vrsqrt.f32 %v2019_v2  ;;  %v1897_v22 = vmul.f32 0.020408163, %v1834_v33  ;;  %v1957_v54 = vmax.f32 %v1933_v5, 0.0  ;;  %v4475_v33 = vld [vmem:[%s4872_s2 + $0x68] sm:$0xff]  ;;  %v1898_v2 = vmul.f32 0.020408163, %v1837_v55 }
 0x28a   :  { %2121 = vrot.lane.b32.xlu0 %v2073_v44, %s3287_s10  ;;  %2127 = vrot.lane.b32.xlu1 %v2076_v59, %s3287_s10  ;;  %v4480_v59 = vld [vmem:[%s4872_s2 + $0x30] sm:$0xff]  ;;  %v2020_v44 = vadd.f32 1e-05, %v1972_v7  ;;  %3258 = vrsqrt.f32 %v2008_v4  ;;  %v2062_v61 = vmul.f32 %v3253_v21, %v4475_v33 }
 0x28b   :  { %v1945_v35 = vsub.f32 %v1897_v22, %v1921_v20  ;;  %v1723_v10 = vpop.xlane.xlu1 %1722  ;;  %v2005_v43 = vadd.f32 1e-05, %v1957_v54  ;;  %v1922_v54 = vmul.f32 %v4490_v14, %v4490_v14 }
 0x28c   :  { %v1720_v46 = vpop.xlane.xlu0 %1719  ;;  %3260 = vrsqrt.f32 %v2020_v44  ;;  %v2086_v7 = vmul.f32 %v2062_v61, %v4393_v3 }
 0x28d   :  { %v1969_v45 = vmax.f32 %v1945_v35, 0.0  ;;  %3262 = vrsqrt.f32 %v2005_v43  ;;  %v1958_v35 = vmax.f32 %v1934_v38, 0.0  ;;  %v4508_v44 = vmul.f32 0.020408163, %v1720_v46 }
 0x28e   :  { %2151 = vrot.lane.b32.xlu1 %v2088_v50, %s3287_s10  ;;  %2145 = vrot.lane.b32.xlu0 %v2085_v31, %s3287_s10  ;;  %v1946_v50 = vsub.f32 %v1898_v2, %v1922_v54 }
 0x28f   :  { %v3255_v41 = vpop.eup %3254  ;;  %v1759_v19 = vpop.xlane.xlu1 %1758  ;;  %v2017_v5 = vadd.f32 1e-05, %v1969_v45  ;;  %v1915_v46 = vmul.f32 %v4508_v44, %v4508_v44 }
 0x290   :  { %v1756_v8 = vpop.xlane.xlu0 %1755  ;;  %v2055_v57 = vmul.f32 %v3255_v41, %v4480_v59  ;;  %v2006_v41 = vadd.f32 1e-05, %v1958_v35  ;;  %v1970_v36 = vmax.f32 %v1946_v50, 0.0 }
 0x291   :  { %3264 = vrsqrt.f32 %v2017_v5 }
 0x292   :  { %2123 = vrot.lane.b32.xlu1 %v2074_v56, %s3287_s10  ;;  %2284 = vperm.xlu0 %3079, %v2062_v61   ;;  %v2079_v6 = vmul.f32 %v2055_v57, %v4407_v17  ;;  %v4513_v17 = vld [vmem:[%s4872_s2 + $0x38] sm:$0xff]  ;;  %v4516_v56 = vmul.f32 0.020408163, %v1723_v10  ;;  %v4531_v10 = vld [vmem:[%s4872_s2 + $0x20] sm:$0xff]  ;;  %3266 = vrsqrt.f32 %v2006_v41  ;;  %v2018_v5 = vadd.f32 1e-05, %v1970_v36 }
 0x293   :  { %v3257_v40 = vpop.eup %3256  ;;  %v1717_v20 = vpop.xlane.xlu1 %1716 }
 0x294   :  { %v1714_v22 = vpop.xlane.xlu0 %1713  ;;  %v2067_v4 = vmul.f32 %v3257_v40, %v4495_v37  ;;  %v3259_v3 = vpop.eup %3258  ;;  %v4521_v40 = vmul.f32 0.020408163, %v1756_v8  ;;  %v1916_v54 = vmul.f32 %v4516_v56, %v4516_v56  ;;  %3268 = vrsqrt.f32 %v2018_v5 }
 0x295   :  { %v4537_v35 = vmul.f32 0.020408163, %v1714_v22  ;;  %v4550_v60 = vmul.f32 0.020408163, %v1717_v20 }
 0x296   :  { %2147 = vrot.lane.b32.xlu1 %v2086_v7, %s3287_s10  ;;  %2133 = vrot.lane.b32.xlu0 %v2079_v6, %s3287_s10  ;;  %v2091_v21 = vmul.f32 %v2067_v4, %v4427_v11  ;;  %v3261_v45 = vpop.eup %3260  ;;  %v2056_v11 = vmul.f32 %v3259_v3, %v4513_v17  ;;  %v4533_v7 = vmul.f32 0.020408163, %v1759_v19  ;;  %v4546_v19 = vld [vmem:[%s4872_s2 + $0x80] sm:$0xff] }
 0x297   :  { %v4505_v55 = vpop.xlane.xlu1 %1752  ;;  %v3263_v12 = vpop.eup %3262 }
 0x298   :  { %v1750_v31 = vpop.xlane.xlu0 %1749  ;;  %v2053_v3 = vmul.f32 %v3263_v12, %v4531_v10  ;;  %v1928_v22 = vmul.f32 %v4533_v7, %v4533_v7 }
 0x29a   :  { %2249 = vperm.xlu1 %3078, %v2055_v57   ;;  %2157 = vrot.lane.b32.xlu0 %v2091_v21, %s3287_s10  ;;  %v4526_v57 = vld [vmem:[%s4872_s2 + $0x98] sm:$0xff]  ;;  %v2077_v16 = vmul.f32 %v2053_v3, %v4433_v29  ;;  %v4562_v29 = vmul.f32 0.020408163, %v4505_v55 }
 0x29b   :  { %v1819_v43 = vpop.xlane.xlu1 %1818  ;;  %v2068_v21 = vmul.f32 %v3261_v45, %v4526_v57 }
 0x29c   :  { %v1816_v61 = vpop.xlane.xlu0 %1815  ;;  %v1892_v2 = vmul.f32 0.020408163, %v1819_v43 }
 0x29d   :  { %v1891_v38 = vmul.f32 0.020408163, %v1816_v61  ;;  %v3265_v61 = vpop.eup %3264 }
 0x29e   :  { %2309 = vperm.xlu1 %3078, %v2067_v4   ;;  %2254 = vperm.xlu0 %3079, %v2056_v11   ;;  %v1927_v4 = vmul.f32 %v4521_v40, %v4521_v40  ;;  %v1940_v43 = vsub.f32 %v1892_v2, %v1916_v54  ;;  %v2065_v2 = vmul.f32 %v3265_v61, %v4546_v19 }
 0x29f   :  { %v1939_v8 = vsub.f32 %v1891_v38, %v1915_v46  ;;  %v1855_v6 = vpop.xlane.xlu1 %1854  ;;  %v2080_v61 = vmul.f32 %v2056_v11, %v4423_v58 }
 0x2a0   :  { %v1852_v50 = vpop.xlane.xlu0 %1851  ;;  %v1904_v46 = vmul.f32 0.020408163, %v1855_v6  ;;  %v4556_v6 = vmul.f32 0.020408163, %v1750_v31  ;;  %v1964_v30 = vmax.f32 %v1940_v43, 0.0  ;;  %v3267_v43 = vpop.eup %3266 }
 0x2a1   :  { %v1963_v41 = vmax.f32 %v1939_v8, 0.0  ;;  %v1903_v36 = vmul.f32 0.020408163, %v1852_v50  ;;  %v1913_v8 = vmul.f32 %v4537_v35, %v4537_v35 }
 0x2a2   :  { %2314 = vperm.xlu0 %3079, %v2068_v21   ;;  %2239 = vperm.xlu1 %3078, %v2053_v3   ;;  %v1952_v15 = vsub.f32 %v1904_v46, %v1928_v22  ;;  %v2012_v55 = vadd.f32 1e-05, %v1964_v30  ;;  %v4587_v30 = vld [vmem:[%s4872_s2 + $0x50] sm:$0xff] }
 0x2a3   :  { %v2011_v45 = vadd.f32 1e-05, %v1963_v41  ;;  %v1951_v12 = vsub.f32 %v1903_v36, %v1927_v4  ;;  %v1813_v38 = vpop.xlane.xlu1 %1812  ;;  %v1914_v36 = vmul.f32 %v4550_v60, %v4550_v60 }
 0x2a4   :  { %v1810_v50 = vpop.xlane.xlu0 %1809  ;;  %v1890_v4 = vmul.f32 0.020408163, %v1813_v38  ;;  %v1976_v38 = vmax.f32 %v1952_v15, 0.0  ;;  %v4582_v15 = vld [vmem:[%s4872_s2 + $0x88] sm:$0xff] }
 0x2a5   :  { %3270 = vrsqrt.f32 %v2011_v45  ;;  %v1975_v5 = vmax.f32 %v1951_v12, 0.0  ;;  %v1889_v54 = vmul.f32 0.020408163, %v1810_v50  ;;  %v2089_v45 = vmul.f32 %v2065_v2, %v4458_v39  ;;  %v4571_v12 = vld [vmem:[%s4872_s2 + $0x28] sm:$0xff] }
 0x2a6   :  { %2129 = vrot.lane.b32.xlu0 %v2077_v16, %s3287_s10  ;;  %2299 = vperm.xlu1 %3078, %v2065_v2   ;;  %v1925_v16 = vmul.f32 %v4556_v6, %v4556_v6  ;;  %v1938_v58 = vsub.f32 %v1890_v4, %v1914_v36  ;;  %v2092_v50 = vmul.f32 %v2068_v21, %v4431_v34  ;;  %v2024_v4 = vadd.f32 1e-05, %v1976_v38 }
 0x2a7   :  { %v2023_v20 = vadd.f32 1e-05, %v1975_v5  ;;  %v1937_v41 = vsub.f32 %v1889_v54, %v1913_v8  ;;  %v1849_v3 = vpop.xlane.xlu1 %1848  ;;  %v2054_v2 = vmul.f32 %v3267_v43, %v4571_v12  ;;  %v3269_v5 = vpop.eup %3268  ;;  %v1926_v54 = vmul.f32 %v4562_v29, %v4562_v29 }
 0x2a8   :  { %v1846_v31 = vpop.xlane.xlu0 %1845  ;;  %v1902_v11 = vmul.f32 0.020408163, %v1849_v3  ;;  %v1962_v21 = vmax.f32 %v1938_v58, 0.0 }
 0x2a9   :  { %3272 = vrsqrt.f32 %v2023_v20  ;;  %v1961_v46 = vmax.f32 %v1937_v41, 0.0  ;;  %v1901_v22 = vmul.f32 0.020408163, %v1846_v31  ;;  %v2078_v3 = vmul.f32 %v2054_v2, %v4470_v42 }
 0x2aa   :  { %2135 = vrot.lane.b32.xlu1 %v2080_v61, %s3287_s10  ;;  %2153 = vrot.lane.b32.xlu0 %v2089_v45, %s3287_s10  ;;  %3274 = vrsqrt.f32 %v2012_v55  ;;  %v1950_v41 = vsub.f32 %v1902_v11, %v1926_v54  ;;  %v2066_v31 = vmul.f32 %v3269_v5, %v4582_v15  ;;  %v4596_v45 = vld [vmem:[%s4872_s2 + $0xb0] sm:$0xff]  ;;  %v4621_v5 = vld [vmem:[%s4872_s2 + $0xb8] sm:$0xff] }
 0x2ab   :  { %v2009_v39 = vadd.f32 1e-05, %v1961_v46  ;;  %v1949_v8 = vsub.f32 %v1901_v22, %v1925_v16  ;;  %v2010_v16 = vadd.f32 1e-05, %v1962_v21  ;;  %v4626_v54 = vld [vmem:[%s4872_s2 + $0xa0] sm:$0xff] }
 0x2ac   :  { %v1974_v46 = vmax.f32 %v1950_v41, 0.0  ;;  %v2090_v22 = vmul.f32 %v2066_v31, %v4490_v14  ;;  %v4613_v14 = vld [vmem:[%s4872_s2 + $0x40] sm:$0xff] }
 0x2ad   :  { %v1973_v20 = vmax.f32 %v1949_v8, 0.0  ;;  %3276 = vrsqrt.f32 %v2009_v39  ;;  %v4608_v8 = vld [vmem:[%s4872_s2 + $0x58] sm:$0xff] }
 0x2ae   :  { %2159 = vrot.lane.b32.xlu1 %v2092_v50, %s3287_s10  ;;  %2244 = vperm.xlu0 %3079, %v2054_v2   ;;  %3278 = vrsqrt.f32 %v2024_v4  ;;  %v2022_v38 = vadd.f32 1e-05, %v1974_v46 }
 0x2af   :  { %v3271_v34 = vpop.eup %3270  ;;  %v2021_v36 = vadd.f32 1e-05, %v1973_v20 }
 0x2b0   :  { %v2059_v61 = vmul.f32 %v3271_v34, %v4587_v30 }
 0x2b1   :  { %3280 = vrsqrt.f32 %v2021_v36  ;;  %v4635_v36 = vld [vmem:[%s4872_s2 + $0x48] sm:$0xff] }
 0x2b2   :  { %2131 = vrot.lane.b32.xlu1 %v2078_v3, %s3287_s10  ;;  %2304 = vperm.xlu0 %3079, %v2066_v31   ;;  %v2083_v42 = vmul.f32 %v2059_v61, %v4508_v44  ;;  %3282 = vrsqrt.f32 %v2010_v16 }
 0x2b3   :  { %v3273_v43 = vpop.eup %3272  ;;  %3284 = vrsqrt.f32 %v2022_v38 }
 0x2b4   :  { %v2071_v55 = vmul.f32 %v3273_v43, %v4596_v45  ;;  %v3275_v58 = vpop.eup %3274 }
 0x2b5   :  { %v2060_v50 = vmul.f32 %v3275_v58, %v4608_v8 }
 0x2b6   :  { %2155 = vrot.lane.b32.xlu1 %v2090_v22, %s3287_s10  ;;  %2141 = vrot.lane.b32.xlu0 %v2083_v42, %s3287_s10  ;;  %v2095_v39 = vmul.f32 %v2071_v55, %v4521_v40 }
 0x2b7   :  { %v3277_v11 = vpop.eup %3276  ;;  %v2084_v20 = vmul.f32 %v2060_v50, %v4516_v56 }
 0x2b8   :  { %v3279_v44 = vpop.eup %3278  ;;  %v2057_v40 = vmul.f32 %v3277_v11, %v4613_v14 }
 0x2b9   :  { %v2072_v34 = vmul.f32 %v3279_v44, %v4621_v5 }
 0x2ba   :  { %2269 = vperm.xlu1 %3078, %v2059_v61   ;;  %2165 = vrot.lane.b32.xlu0 %v2095_v39, %s3287_s10  ;;  %v2081_v4 = vmul.f32 %v2057_v40, %v4537_v35  ;;  %v4645_v61 = vld [vmem:[%s4872_s2 + $0xa8] sm:$0xff] }
 0x2bb   :  { %v3281_v2 = vpop.eup %3280  ;;  %v2096_v3 = vmul.f32 %v2072_v34, %v4533_v7 }
 0x2bc   :  { %v2069_v21 = vmul.f32 %v3281_v2, %v4626_v54  ;;  %v3283_v41 = vpop.eup %3282 }
 0x2bd   :  { %v2058_v35 = vmul.f32 %v3283_v41, %v4635_v36  ;;  %v3285_v31 = vpop.eup %3284 }
 0x2be   :  { %2274 = vperm.xlu0 %3079, %v2060_v50   ;;  %2259 = vperm.xlu1 %3078, %v2057_v40   ;;  %v2093_v56 = vmul.f32 %v2069_v21, %v4556_v6  ;;  %v2070_v16 = vmul.f32 %v3285_v31, %v4645_v61  ;;  %v3288_v6 = vmov 1  }
 0x2bf   :  { %v2082_v43 = vmul.f32 %v2058_v35, %v4550_v60 }
 0x2c0   :  { %v2094_v7 = vmul.f32 %v2070_v16, %v4562_v29 }
 0x2c2   :  { %2143 = vrot.lane.b32.xlu1 %v2084_v20, %s3287_s10  ;;  %2137 = vrot.lane.b32.xlu0 %v2081_v4, %s3287_s10 }
 0x2c6   :  { %2167 = vrot.lane.b32.xlu1 %v2096_v3, %s3287_s10  ;;  %2161 = vrot.lane.b32.xlu0 %v2093_v56, %s3287_s10 }
 0x2ca   :  { %2139 = vrot.lane.b32.xlu1 %v2082_v43, %s3287_s10  ;;  %2264 = vperm.xlu0 %3079, %v2058_v35  }
 0x2ce   :  { %2163 = vrot.lane.b32.xlu1 %v2094_v7, %s3287_s10  ;;  %2324 = vperm.xlu0 %3079, %v2070_v16  }
 0x2d2   :  { %2319 = vperm.xlu1 %3078, %v2069_v21   ;;  %2334 = vperm.xlu0 %3079, %v2072_v34  }
 0x2d6   :  { %2329 = vperm.xlu1 %3078, %v2071_v55   ;;  %3081 = vset.pattern.permute.xlu0 %v3288_v6 }
 0x2da   :  { %3080 = vset.pattern.permute.xlu1 %v3288_v6 }
 0x2ed   :  { %v4654_v46 = vpop.permute.xlu1 %2229 }
 0x2f1   :  { %v4656_v22 = vpop.permute.xlu1 %2289 }
 0x2f9   :  { %v4658_v60 = vpop.permute.xlu0 %2219 }
 0x2fd   :  { %v4660_v42 = vpop.permute.xlu1 %2279  ;;  %v2150_v38 = vpop.permute.xlu0 %2149 }
 0x2fe   :  { %v2207_v29 = vsub.f32 %v4389_v52, %v2150_v38 }
 0x300   :  { %2433 = vperm.xlu0 %3081, %v2207_v29  }
 0x301   :  { %v2126_v58 = vpop.permute.xlu1 %2125  ;;  %v4663_v39 = vpop.permute.xlu0 %2234 }
 0x302   :  { %v2195_v55 = vsub.f32 %v4383_v62, %v2126_v58 }
 0x304   :  { %2373 = vperm.xlu1 %3080, %v2195_v55  }
 0x305   :  { %v4666_v11 = vpop.permute.xlu1 %2224  ;;  %v4668_v44 = vpop.permute.xlu0 %2294 }
 0x309   :  { %v2128_v50 = vpop.permute.xlu1 %2127  ;;  %v2122_v40 = vpop.permute.xlu0 %2121 }
 0x30a   :  { %v2193_v2 = vsub.f32 %v4402_v49, %v2122_v40  ;;  %v2196_v52 = vsub.f32 %v4421_v0, %v2128_v50 }
 0x30c   :  { %2363 = vperm.xlu1 %3080, %v2193_v2  }
 0x30d   :  { %v2152_v20 = vpop.permute.xlu1 %2151  ;;  %v2146_v4 = vpop.permute.xlu0 %2145 }
 0x30e   :  { %v2205_v34 = vsub.f32 %v4412_v63, %v2146_v4  ;;  %v2208_v41 = vsub.f32 %v4444_v1, %v2152_v20 }
 0x310   :  { %2378 = vperm.xlu1 %3080, %v2196_v52   ;;  %2423 = vperm.xlu0 %3081, %v2205_v34  }
 0x311   :  { %v2124_v21 = vpop.permute.xlu1 %2123  ;;  %v4673_v62 = vpop.permute.xlu0 %2284 }
 0x312   :  { %v2194_v3 = vsub.f32 %v4449_v27, %v2124_v21 }
 0x314   :  { %2438 = vperm.xlu1 %3080, %v2208_v41   ;;  %2368 = vperm.xlu0 %3081, %v2194_v3  }
 0x315   :  { %v2148_v56 = vpop.permute.xlu1 %2147  ;;  %v2134_v49 = vpop.permute.xlu0 %2133 }
 0x316   :  { %v2206_v35 = vsub.f32 %v4475_v33, %v2148_v56  ;;  %v2199_v31 = vsub.f32 %v4480_v59, %v2134_v49 }
 0x318   :  { %2428 = vperm.xlu1 %3080, %v2206_v35   ;;  %2393 = vperm.xlu0 %3081, %v2199_v31  }
 0x319   :  { %v4679_v63 = vpop.permute.xlu1 %2249  ;;  %v2158_v0 = vpop.permute.xlu0 %2157 }
 0x31a   :  { %v2211_v43 = vsub.f32 %v4495_v37, %v2158_v0 }
 0x31c   :  { %2453 = vperm.xlu0 %3081, %v2211_v43  }
 0x31d   :  { %v4682_v16 = vpop.permute.xlu1 %2309  ;;  %v4684_v1 = vpop.permute.xlu0 %2254 }
 0x321   :  { %v4686_v27 = vpop.permute.xlu1 %2239  ;;  %v4688_v7 = vpop.permute.xlu0 %2314 }
 0x325   :  { %v4690_v6 = vpop.permute.xlu1 %2299  ;;  %v2130_v33 = vpop.permute.xlu0 %2129 }
 0x326   :  { %v2197_v59 = vsub.f32 %v4531_v10, %v2130_v33 }
 0x328   :  { %2383 = vperm.xlu0 %3081, %v2197_v59  }
 0x329   :  { %v2136_v38 = vpop.permute.xlu1 %2135  ;;  %v2154_v29 = vpop.permute.xlu0 %2153 }
 0x32a   :  { %v2200_v58 = vsub.f32 %v4513_v17, %v2136_v38  ;;  %v2209_v37 = vsub.f32 %v4546_v19, %v2154_v29 }
 0x32c   :  { %2398 = vperm.xlu1 %3080, %v2200_v58   ;;  %2443 = vperm.xlu0 %3081, %v2209_v37  }
 0x32d   :  { %v2160_v55 = vpop.permute.xlu1 %2159  ;;  %v4695_v50 = vpop.permute.xlu0 %2244 }
 0x32e   :  { %v2212_v40 = vsub.f32 %v4526_v57, %v2160_v55 }
 0x330   :  { %2458 = vperm.xlu1 %3080, %v2212_v40  }
 0x331   :  { %v2132_v2 = vpop.permute.xlu1 %2131  ;;  %v4698_v20 = vpop.permute.xlu0 %2304 }
 0x332   :  { %v2198_v10 = vsub.f32 %v4571_v12, %v2132_v2 }
 0x334   :  { %2388 = vperm.xlu1 %3080, %v2198_v10  }
 0x335   :  { %v2156_v4 = vpop.permute.xlu1 %2155  ;;  %v2142_v52 = vpop.permute.xlu0 %2141 }
 0x336   :  { %v2210_v17 = vsub.f32 %v4582_v15, %v2156_v4  ;;  %v2203_v19 = vsub.f32 %v4587_v30, %v2142_v52 }
 0x338   :  { %2448 = vperm.xlu1 %3080, %v2210_v17   ;;  %2413 = vperm.xlu0 %3081, %v2203_v19  }
 0x339   :  { %v4703_v34 = vpop.permute.xlu1 %2269  ;;  %v2166_v21 = vpop.permute.xlu0 %2165 }
 0x33a   :  { %v2215_v0 = vsub.f32 %v4596_v45, %v2166_v21  ;;  %v2351_v45 = vmul.f32 %v4656_v22, %v4163_v23  ;;  %v2337_v23 = vmul.f32 %v4658_v60, %v4166_v51  ;;  %v2338_v51 = vmul.f32 %v4666_v11, %v4180_v48 }
 0x33b   :  { %v2352_v60 = vmul.f32 %v4668_v44, %v4177_v32  ;;  %v2350_v48 = vmul.f32 %v4673_v62, %v4185_v24  ;;  %v2343_v32 = vmul.f32 %v4679_v63, %v4192_v18  ;;  %v2355_v24 = vmul.f32 %v4682_v16, %v4195_v25 }
 0x33c   :  { %v2341_v25 = vmul.f32 %v4686_v27, %v4198_v28 }
 0x33d   :  { %v4705_v41 = vpop.permute.xlu1 %2259  ;;  %v4707_v57 = vpop.permute.xlu0 %2274 }
 0x341   :  { %v2144_v3 = vpop.permute.xlu1 %2143  ;;  %v2138_v56 = vpop.permute.xlu0 %2137 }
 0x342   :  { %v2204_v12 = vsub.f32 %v4608_v8, %v2144_v3  ;;  %v2201_v49 = vsub.f32 %v4613_v14, %v2138_v56 }
 0x344   :  { %2418 = vperm.xlu1 %3080, %v2204_v12   ;;  %2403 = vperm.xlu0 %3081, %v2201_v49  }
 0x345   :  { %v2168_v15 = vpop.permute.xlu1 %2167  ;;  %v2162_v35 = vpop.permute.xlu0 %2161 }
 0x346   :  { %v2213_v30 = vsub.f32 %v4626_v54, %v2162_v35  ;;  %v2216_v8 = vsub.f32 %v4621_v5, %v2168_v15 }
 0x348   :  { %2463 = vperm.xlu0 %3081, %v2213_v30  }
 0x349   :  { %v2140_v31 = vpop.permute.xlu1 %2139  ;;  %v4716_v14 = vpop.permute.xlu0 %2264 }
 0x34a   :  { %v2202_v43 = vsub.f32 %v4635_v36, %v2140_v31 }
 0x34c   :  { %2408 = vperm.xlu1 %3080, %v2202_v43   ;;  %2473 = vperm.xlu0 %3081, %v2215_v0   ;;  %v2344_v43 = vmul.f32 %v4684_v1, %v4204_v13  ;;  %v4897_v13 = vld [vmem:[#allocation3_spill] sm:$0xff] }
 0x34d   :  { %v2164_v33 = vpop.permute.xlu1 %2163  ;;  %v4718_v38 = vpop.permute.xlu0 %2324  ;;  %v2342_v1 = vmul.f32 %v4695_v50, %v4897_v13 }
 0x34e   :  { %v2214_v59 = vsub.f32 %v4645_v61, %v2164_v33  ;;  %v2339_v61 = vmul.f32 %v4654_v46, %v4160_v9  ;;  %v2349_v9 = vmul.f32 %v4660_v42, %v4169_v53  ;;  %v2340_v46 = vmul.f32 %v4663_v39, %v4172_v26 }
 0x34f   :  { %v2353_v33 = vmul.f32 %v4690_v6, %v4201_v47 }
 0x350   :  { %2468 = vperm.xlu1 %3080, %v2214_v59  }
 0x351   :  { %v4720_v54 = vpop.permute.xlu1 %2319  ;;  %v4722_v29 = vpop.permute.xlu0 %2334 }
 0x354   :  { %2478 = vperm.xlu1 %3080, %v2216_v8  }
 0x355   :  { %v4726_v36 = vpop.permute.xlu1 %2329 }
 0x37f   :  { %v2434_v58 = vpop.permute.xlu0 %2433 }
 0x380   :  { %v2495_v37 = vadd.f32 %v2434_v58, %v2351_v45 }
 0x382   :  { %v2519_v5 = vmax.f32 %v2495_v37, 0.0 }
 0x383   :  { %v2374_v55 = vpop.permute.xlu1 %2373 }
 0x384   :  { %2543 = vst.msk [vmem:[%s4873_s3 + $0x70] sm:$0xff] %vm1687_vm1, %v2519_v5  ;;  %v2483_v40 = vadd.f32 %v2374_v55, %v2339_v61  ;;  %v4896_v61 = vld [vmem:[#allocation2_spill] sm:$0xff] }
 0x385   :  { %v2356_v28 = vmul.f32 %v4688_v7, %v4896_v61 }
 0x386   :  { %v2507_v2 = vmax.f32 %v2483_v40, 0.0 }
 0x388   :  { %2531 = vst.msk [vmem:[%s4873_s3 + $0x10] sm:$0xff] %vm1687_vm1, %v2507_v2  ;;  %v4898_v2 = vld [vmem:[#allocation4_spill] sm:$0xff] }
 0x38b   :  { %v2364_v22 = vpop.permute.xlu1 %2363 }
 0x38c   :  { %v2481_v10 = vadd.f32 %v2364_v22, %v2337_v23  ;;  %v2354_v23 = vmul.f32 %v4698_v20, %v4898_v2  ;;  %v4899_v22 = vld [vmem:[#allocation5_spill] sm:$0xff]  ;;  %v4900_v20 = vld [vmem:[#allocation7_spill] sm:$0xff] }
 0x38e   :  { %v2505_v4 = vmax.f32 %v2481_v10, 0.0  ;;  %v2347_v10 = vmul.f32 %v4703_v34, %v4899_v22  ;;  %v2345_v34 = vmul.f32 %v4705_v41, %v4900_v20 }
 0x38f   :  { %v2379_v52 = vpop.permute.xlu1 %2378  ;;  %v2424_v17 = vpop.permute.xlu0 %2423 }
 0x390   :  { %2529 = vst.msk [vmem:[%s4873_s3] sm:$0xff] %vm1687_vm1, %v2505_v4  ;;  %v2484_v19 = vadd.f32 %v2379_v52, %v2340_v46  ;;  %v2493_v21 = vadd.f32 %v2424_v17, %v2349_v9 }
 0x392   :  { %v2508_v53 = vmax.f32 %v2484_v19, 0.0  ;;  %v2517_v42 = vmax.f32 %v2493_v21, 0.0  ;;  %v4901_v21 = vld [vmem:[#allocation9_spill] sm:$0xff] }
 0x393   :  { %v2439_v3 = vpop.permute.xlu1 %2438  ;;  %v2369_v26 = vpop.permute.xlu0 %2368 }
 0x394   :  { %2532 = vst.msk [vmem:[%s4873_s3 + $0x18] sm:$0xff] %vm1687_vm1, %v2508_v53  ;;  %2541 = vst.msk [vmem:[%s4873_s3 + $0x60] sm:$0xff] %vm1687_vm1, %v2517_v42  ;;  %v2496_v39 = vadd.f32 %v2439_v3, %v2352_v60  ;;  %v2482_v56 = vadd.f32 %v2369_v26, %v2338_v51  ;;  %v2348_v51 = vmul.f32 %v4707_v57, %v4901_v21  ;;  %v4902_v26 = vld [vmem:[#allocation8_spill] sm:$0xff]  ;;  %v4903_v57 = vld [vmem:[#allocation11_spill] sm:$0xff] }
 0x396   :  { %v2520_v11 = vmax.f32 %v2496_v39, 0.0  ;;  %v2506_v44 = vmax.f32 %v2482_v56, 0.0  ;;  %v2357_v39 = vmul.f32 %v4720_v54, %v4902_v26 }
 0x397   :  { %v2429_v12 = vpop.permute.xlu1 %2428  ;;  %v2394_v49 = vpop.permute.xlu0 %2393 }
 0x398   :  { %2544 = vst.msk [vmem:[%s4873_s3 + $0x78] sm:$0xff] %vm1687_vm1, %v2520_v11  ;;  %2530 = vst.msk [vmem:[%s4873_s3 + $0x8] sm:$0xff] %vm1687_vm1, %v2506_v44  ;;  %v2494_v15 = vadd.f32 %v2429_v12, %v2350_v48  ;;  %v2487_v35 = vadd.f32 %v2394_v49, %v2343_v32  ;;  %v2346_v11 = vmul.f32 %v4716_v14, %v4903_v57  ;;  %v4904_v44 = vld [vmem:[#allocation6_spill] sm:$0xff] }
 0x399   :  { %v2359_v54 = vmul.f32 %v4726_v36, %v4904_v44  ;;  %v4906_v36 = vld [vmem:[#allocation10_spill] sm:$0xff] }
 0x39a   :  { %v2518_v18 = vmax.f32 %v2494_v15, 0.0  ;;  %v2511_v62 = vmax.f32 %v2487_v35, 0.0 }
 0x39b   :  { %v2454_v63 = vpop.permute.xlu0 %2453 }
 0x39c   :  { %2542 = vst.msk [vmem:[%s4873_s3 + $0x68] sm:$0xff] %vm1687_vm1, %v2518_v18  ;;  %2535 = vst.msk [vmem:[%s4873_s3 + $0x30] sm:$0xff] %vm1687_vm1, %v2511_v62  ;;  %v2499_v30 = vadd.f32 %v2454_v63, %v2355_v24  ;;  %v4905_v18 = vld [vmem:[#allocation12_spill] sm:$0xff] }
 0x39d   :  { %v2358_v62 = vmul.f32 %v4718_v38, %v4905_v18 }
 0x39e   :  { %v2523_v31 = vmax.f32 %v2499_v30, 0.0 }
 0x3a0   :  { %2547 = vst.msk [vmem:[%s4873_s3 + $0x90] sm:$0xff] %vm1687_vm1, %v2523_v31 }
 0x3a7   :  { %v2384_v16 = vpop.permute.xlu0 %2383 }
 0x3a8   :  { %v2485_v0 = vadd.f32 %v2384_v16, %v2341_v25  ;;  %v2360_v25 = vmul.f32 %v4722_v29, %v4906_v36 }
 0x3aa   :  { %v2509_v59 = vmax.f32 %v2485_v0, 0.0 }
 0x3ab   :  { %v2399_v8 = vpop.permute.xlu1 %2398  ;;  %v2444_v45 = vpop.permute.xlu0 %2443 }
 0x3ac   :  { %2533 = vst.msk [vmem:[%s4873_s3 + $0x20] sm:$0xff] %vm1687_vm1, %v2509_v59  ;;  %v2488_v58 = vadd.f32 %v2399_v8, %v2344_v43  ;;  %v2497_v37 = vadd.f32 %v2444_v45, %v2353_v33 }
 0x3ae   :  { %v2512_v27 = vmax.f32 %v2488_v58, 0.0  ;;  %v2521_v5 = vmax.f32 %v2497_v37, 0.0 }
 0x3af   :  { %v2459_v55 = vpop.permute.xlu1 %2458 }
 0x3b0   :  { %2536 = vst.msk [vmem:[%s4873_s3 + $0x38] sm:$0xff] %vm1687_vm1, %v2512_v27  ;;  %2545 = vst.msk [vmem:[%s4873_s3 + $0x80] sm:$0xff] %vm1687_vm1, %v2521_v5  ;;  %v2500_v47 = vadd.f32 %v2459_v55, %v2356_v28 }
 0x3b2   :  { %v2524_v6 = vmax.f32 %v2500_v47, 0.0 }
 0x3b3   :  { %v2389_v40 = vpop.permute.xlu1 %2388 }
 0x3b4   :  { %2548 = vst.msk [vmem:[%s4873_s3 + $0x98] sm:$0xff] %vm1687_vm1, %v2524_v6  ;;  %v2486_v7 = vadd.f32 %v2389_v40, %v2342_v1 }
 0x3b6   :  { %v2510_v9 = vmax.f32 %v2486_v7, 0.0 }
 0x3b7   :  { %v2449_v46 = vpop.permute.xlu1 %2448  ;;  %v2414_v4 = vpop.permute.xlu0 %2413 }
 0x3b8   :  { %2534 = vst.msk [vmem:[%s4873_s3 + $0x28] sm:$0xff] %vm1687_vm1, %v2510_v9  ;;  %v2498_v50 = vadd.f32 %v2449_v46, %v2354_v23  ;;  %v2491_v52 = vadd.f32 %v2414_v4, %v2347_v10 }
 0x3ba   :  { %v2522_v17 = vmax.f32 %v2498_v50, 0.0  ;;  %v2515_v19 = vmax.f32 %v2491_v52, 0.0 }
 0x3bc   :  { %2546 = vst.msk [vmem:[%s4873_s3 + $0x88] sm:$0xff] %vm1687_vm1, %v2522_v17  ;;  %2539 = vst.msk [vmem:[%s4873_s3 + $0x50] sm:$0xff] %vm1687_vm1, %v2515_v19 }
 0x3c3   :  { %v2419_v60 = vpop.permute.xlu1 %2418  ;;  %v2404_v53 = vpop.permute.xlu0 %2403 }
 0x3c4   :  { %v2492_v42 = vadd.f32 %v2419_v60, %v2348_v51  ;;  %v2489_v3 = vadd.f32 %v2404_v53, %v2345_v34 }
 0x3c6   :  { %v2516_v56 = vmax.f32 %v2492_v42, 0.0  ;;  %v2513_v48 = vmax.f32 %v2489_v3, 0.0 }
 0x3c7   :  { %v2464_v32 = vpop.permute.xlu0 %2463 }
 0x3c8   :  { %2540 = vst.msk [vmem:[%s4873_s3 + $0x58] sm:$0xff] %vm1687_vm1, %v2516_v56  ;;  %2537 = vst.msk [vmem:[%s4873_s3 + $0x40] sm:$0xff] %vm1687_vm1, %v2513_v48  ;;  %v2501_v41 = vadd.f32 %v2464_v32, %v2357_v39 }
 0x3ca   :  { %v2525_v12 = vmax.f32 %v2501_v41, 0.0 }
 0x3cb   :  { %v2409_v49 = vpop.permute.xlu1 %2408  ;;  %v2474_v15 = vpop.permute.xlu0 %2473 }
 0x3cc   :  { %2549 = vst.msk [vmem:[%s4873_s3 + $0xa0] sm:$0xff] %vm1687_vm1, %v2525_v12  ;;  %v2490_v35 = vadd.f32 %v2409_v49, %v2346_v11  ;;  %v2503_v24 = vadd.f32 %v2474_v15, %v2359_v54 }
 0x3ce   :  { %v2514_v63 = vmax.f32 %v2490_v35, 0.0  ;;  %v2527_v30 = vmax.f32 %v2503_v24, 0.0 }
 0x3cf   :  { %v2469_v31 = vpop.permute.xlu1 %2468 }
 0x3d0   :  { %2538 = vst.msk [vmem:[%s4873_s3 + $0x48] sm:$0xff] %vm1687_vm1, %v2514_v63  ;;  %2551 = vst.msk [vmem:[%s4873_s3 + $0xb0] sm:$0xff] %vm1687_vm1, %v2527_v30  ;;  %v2502_v14 = vadd.f32 %v2469_v31, %v2358_v62 }
 0x3d2   :  { %v2526_v16 = vmax.f32 %v2502_v14, 0.0 }
 0x3d3   :  { %v2479_v0 = vpop.permute.xlu1 %2478 }
 0x3d4   :  { %2550 = vst.msk [vmem:[%s4873_s3 + $0xa8] sm:$0xff] %vm1687_vm1, %v2526_v16  ;;  %v2504_v38 = vadd.f32 %v2479_v0, %v2360_v25 }
 0x3d6   :  { %v2528_v43 = vmax.f32 %v2504_v38, 0.0 }
 0x3d8   :  { %2552 = vst.msk [vmem:[%s4873_s3 + $0xb8] sm:$0xff] %vm1687_vm1, %v2528_v43 }

</bundles_post_ra>
